<compile_context>
chip_gen: v5e
topology: v5e:2x2
jax: 0.10.0
libtpu: 0.0.40
codegen_flags: <defaults>
</compile_context>

<pallas_src>
import functools

import jax
import jax.numpy as jnp
from jax.experimental import pallas as pl
from jax.experimental.pallas import tpu as pltpu

NEG_SLOPE = 0.01      # F.leaky_relu / nn.LeakyReLU default
STATE_SHAPE = 256     # QMixNet.state_shape


def _leaky(v):
    return jnp.where(v > 0, v, NEG_SLOPE * v)


def _elu(v):
    # F.elu, alpha = 1 (clamp the exp argument: jnp.where evaluates both sides)
    return jnp.where(v > 0, v, jnp.exp(jnp.minimum(v, 0.0)) - 1.0)


def _round_up(x, m):
    return ((x + m - 1) // m) * m


def qmix_kernel(s_ref, q_ref,
                wf_ref, bf_ref,
                wh_ref, bh_ref,
                w22_ref, bb22_ref,
                out_ref, *, num_agents, qmix_hidden_dim):
    a_n, h = num_agents, qmix_hidden_dim

    # fc1: (T, D) @ (D, 256) on the MXU in bf16, f32 accumulation.
    x = jnp.dot(s_ref[...].astype(jnp.bfloat16), wf_ref[...],
                preferred_element_type=jnp.float32) + bf_ref[...]
    x = _leaky(x)                                                  # (T, 256) f32

    # Fused hypernet heads: ONE (T,256) @ (256,256) matmul, then static slices.
    heads = jnp.dot(x.astype(jnp.bfloat16), wh_ref[...],
                    preferred_element_type=jnp.float32) + bh_ref[...]
    w1 = jnp.abs(heads[:, :a_n * h])                               # (T, A*H)
    b1 = heads[:, a_n * h:a_n * h + h]                             # (T, H)
    w2 = jnp.abs(heads[:, a_n * h + h:a_n * h + 2 * h])            # (T, H)
    hb = _leaky(heads[:, a_n * h + 2 * h:a_n * h + 3 * h])         # (T, H)

    # Mixer: hidden[n, j] = elu( sum_a q[n, a] * w1[n, a*H + j] + b1[n, j] )
    # (matches torch's w1.view(B, T, num_agents, qmix_hidden_dim) ordering).
    q = q_ref[...].astype(jnp.float32)                             # (T, A)
    acc = b1
    for a in range(a_n):
        acc = acc + q[:, a:a + 1] * w1[:, a * h:(a + 1) * h]
    hidden = _elu(acc)                                             # (T, H)

    # q_total[n] = sum_j hidden*w2 + (hyper_b2_2 folded into the reduction)
    out_ref[...] = (jnp.sum(hidden * w2 + hb * w22_ref[...],
                            axis=1, keepdims=True) + bb22_ref[...])


def init_params(key, state_dim, num_agents, qmix_hidden_dim):
    ks = jax.random.split(key, 12)
    norm = lambda k, shape: 0.1 * jax.random.normal(k, shape, jnp.float32)
    ah = num_agents * qmix_hidden_dim
    return {
        # torch nn.Linear layout: weight (out_features, in_features)
        "fc1_w": norm(ks[0], (STATE_SHAPE, state_dim)),
        "fc1_b": norm(ks[1], (STATE_SHAPE,)),
        "hyper_w1_w": norm(ks[2], (ah, STATE_SHAPE)),
        "hyper_w1_b": norm(ks[3], (ah,)),
        "hyper_b1_w": norm(ks[4], (qmix_hidden_dim, STATE_SHAPE)),
        "hyper_b1_b": norm(ks[5], (qmix_hidden_dim,)),
        "hyper_w2_w": norm(ks[6], (qmix_hidden_dim, STATE_SHAPE)),
        "hyper_w2_b": norm(ks[7], (qmix_hidden_dim,)),
        "hyper_b2_1_w": norm(ks[8], (qmix_hidden_dim, STATE_SHAPE)),
        "hyper_b2_1_b": norm(ks[9], (qmix_hidden_dim,)),
        "hyper_b2_2_w": norm(ks[10], (1, qmix_hidden_dim)),
        "hyper_b2_2_b": norm(ks[11], (1,)),
    }


def _pick_tile(n, tile_n):
    if n >= 256:
        # Ensure the grid has >= 2 steps so both v7x TensorCores get work.
        half = _round_up(-(-n // 2), 8)
        return min(tile_n, half)
    return min(tile_n, _round_up(n, 8))


def qmix_forward(q_values, s, params, *, num_agents, qmix_hidden_dim,
                 tile_n=512):
    batch, len_step = s.shape[0], s.shape[1]
    n = batch * len_step
    a = num_agents
    h = qmix_hidden_dim
    state_dim = 1
    for d in s.shape[2:]:
        state_dim *= d

    tile = _pick_tile(n, tile_n)
    n_pad = _round_up(n, tile)

    # Natural layout: samples on sublanes, features on lanes (no transpose, no
    # feature-dim padding of the state -> single HBM pass over the state).
    s_flat = s.reshape(n, state_dim)
    q_flat = q_values.reshape(n, a)
    if n_pad != n:
        s_flat = jnp.pad(s_flat, ((0, n_pad - n), (0, 0)))
        q_flat = jnp.pad(q_flat, ((0, n_pad - n), (0, 0)))

    # bf16 weights for the two MXU matmuls.
    wf_t = params["fc1_w"].T.astype(jnp.bfloat16)                  # (D, 256)
    bf_row = params["fc1_b"].reshape(1, -1).astype(jnp.float32)    # (1, 256)

    head_out = a * h + 3 * h                                       # 224
    head_pad = _round_up(head_out, 128)                            # 256
    w_cat = jnp.concatenate([params["hyper_w1_w"], params["hyper_b1_w"],
                             params["hyper_w2_w"], params["hyper_b2_1_w"]],
                            axis=0)                                # (224, 256)
    wh = jnp.zeros((STATE_SHAPE, head_pad), jnp.bfloat16)
    wh = wh.at[:, :head_out].set(w_cat.T.astype(jnp.bfloat16))     # (256, 256)
    b_cat = jnp.concatenate([params["hyper_w1_b"], params["hyper_b1_b"],
                             params["hyper_w2_b"], params["hyper_b2_1_b"]],
                            axis=0)
    bh = jnp.zeros((1, head_pad), jnp.float32)
    bh = bh.at[0, :head_out].set(b_cat.astype(jnp.float32))        # (1, 256)

    w22_row = params["hyper_b2_2_w"].reshape(1, h).astype(jnp.float32)
    bb22 = params["hyper_b2_2_b"].reshape(1, 1).astype(jnp.float32)

    inputs = (s_flat, q_flat, wf_t, bf_row, wh, bh, w22_row, bb22)

    def const_spec(arr):
        # VMEM-resident weight, fetched once (constant index map).
        return pl.BlockSpec(arr.shape, lambda i: (0, 0))

    in_specs = [
        pl.BlockSpec((tile, state_dim), lambda i: (i, 0)),   # state tile
        pl.BlockSpec((tile, a), lambda i: (i, 0)),           # q_values tile
    ] + [const_spec(w) for w in inputs[2:]]

    grid_spec = pltpu.PrefetchScalarGridSpec(
        num_scalar_prefetch=0,
        grid=(n_pad // tile,),
        in_specs=in_specs,
        out_specs=pl.BlockSpec((tile, 1), lambda i: (i, 0)),
    )

    flops = int(n_pad) * int(2 * state_dim * STATE_SHAPE
                             + 2 * STATE_SHAPE * head_pad
                             + 2 * a * h + 4 * h)
    transcendentals = int(n_pad) * int(h)
    bytes_accessed = int(n_pad * (state_dim * s_flat.dtype.itemsize
                                  + a * q_flat.dtype.itemsize + 4)
                         + wf_t.size * 2 + wh.size * 2
                         + (STATE_SHAPE + head_pad + h + 1) * 4)

    kernel = functools.partial(qmix_kernel, num_agents=num_agents,
                               qmix_hidden_dim=qmix_hidden_dim)
    out = pl.pallas_call(
        kernel,
        out_shape=jax.ShapeDtypeStruct((n_pad, 1), jnp.float32),
        grid_spec=grid_spec,
        compiler_params=pltpu.CompilerParams(
            dimension_semantics=("parallel",),
            vmem_limit_bytes=32 * 1024 * 1024),
        cost_estimate=pl.CostEstimate(flops=flops,
                                      transcendentals=transcendentals,
                                      bytes_accessed=bytes_accessed),
    )(*inputs)

    return out[:n, 0].reshape(batch, len_step, 1)


def qmix_reference(q_values, s, params, *, num_agents, qmix_hidden_dim):
    """Pure-JAX replica of the torch QMixNet.forward (f32), for verification."""
    batch, len_step = s.shape[0], s.shape[1]
    hp = jax.lax.Precision.HIGHEST
    x = s.reshape(batch, len_step, -1).astype(jnp.float32)
    x = _leaky(jnp.dot(x, params["fc1_w"].T, precision=hp) + params["fc1_b"])
    q = q_values.reshape(batch, len_step, -1, num_agents).astype(jnp.float32)
    w1 = jnp.abs(jnp.dot(x, params["hyper_w1_w"].T, precision=hp)
                 + params["hyper_w1_b"])
    b1 = jnp.dot(x, params["hyper_b1_w"].T, precision=hp) + params["hyper_b1_b"]
    w1 = w1.reshape(batch, len_step, num_agents, qmix_hidden_dim)
    b1 = b1.reshape(batch, len_step, 1, qmix_hidden_dim)
    hidden = _elu(jnp.matmul(q, w1, precision=hp) + b1)
    w2 = jnp.abs(jnp.dot(x, params["hyper_w2_w"].T, precision=hp)
                 + params["hyper_w2_b"])[..., None]                  # (B,T,H,1)
    hb = _leaky(jnp.dot(x, params["hyper_b2_1_w"].T, precision=hp)
                + params["hyper_b2_1_b"])
    b2 = jnp.dot(hb, params["hyper_b2_2_w"].T, precision=hp) + params["hyper_b2_2_b"]
    q_total = jnp.matmul(hidden, w2, precision=hp).squeeze(2) + b2   # (B,T,1)
    return q_total.reshape(batch, len_step, 1)


if __name__ == "__main__":
    key = jax.random.PRNGKey(0)
    k_s, k_q, k_p = jax.random.split(key, 3)

    batch, len_step = 2, 4
    num_agents, qmix_hidden_dim = 4, 32
    # env != 'Harvest' branch: state features = 25 * 18 * 3 = 1350
    s = jax.random.normal(k_s, (batch, len_step, 25, 18, 3), dtype=jnp.float32)
    q_values = jax.random.normal(k_q, (batch, len_step, num_agents),
                                 dtype=jnp.float32)
    params = init_params(k_p, state_dim=25 * 18 * 3, num_agents=num_agents,
                         qmix_hidden_dim=qmix_hidden_dim)

    out = qmix_forward(q_values, s, params, num_agents=num_agents,
                       qmix_hidden_dim=qmix_hidden_dim)
    out = jax.block_until_ready(out)

    ref = qmix_reference(q_values, s, params, num_agents=num_agents,
                         qmix_hidden_dim=qmix_hidden_dim)
    rel = float(jnp.max(jnp.abs(out - ref)) / (jnp.max(jnp.abs(ref)) + 1e-6))
    assert out.shape == (batch, len_step, 1), out.shape
    # Tolerance accounts for bf16 MXU inputs (f32 accumulation) vs the f32
    # HIGHEST-precision reference: expected ~1% relative error.
    assert rel < 3e-2, f"mismatch vs reference: rel={rel}"

    print("KERNEL_OK")
</pallas_src>

<mosaic_0001>
module attributes {stable_mosaic.version = 11 : i64} {
  func.func @qmix_kernel(%arg0: i32, %arg1: memref<8x1350xf32, #tpu.memory_space<vmem>>, %arg2: memref<8x4xf32, #tpu.memory_space<vmem>>, %arg3: memref<1350x256xbf16, #tpu.memory_space<vmem>>, %arg4: memref<1x256xf32, #tpu.memory_space<vmem>>, %arg5: memref<256x256xbf16, #tpu.memory_space<vmem>>, %arg6: memref<1x256xf32, #tpu.memory_space<vmem>>, %arg7: memref<1x32xf32, #tpu.memory_space<vmem>>, %arg8: memref<1x1xf32, #tpu.memory_space<vmem>>, %arg9: memref<8x1xf32, #tpu.memory_space<vmem>>) attributes {dimension_semantics = [#tpu.dimension_semantics<parallel>], iteration_bounds = array<i64: 1>, scalar_prefetch = 0 : i64, scratch_operands = 0 : i64, tpu.core_type = #tpu.core_type<tc>, window_params = [{transform_indices = @transform_0, window_bounds = array<i64: 8, 1350>}, {transform_indices = @transform_1, window_bounds = array<i64: 8, 4>}, {pipeline_mode = #tpu.pipeline_mode<synchronous>, transform_indices = @transform_2, window_bounds = array<i64: 1350, 256>}, {pipeline_mode = #tpu.pipeline_mode<synchronous>, transform_indices = @transform_3, window_bounds = array<i64: 1, 256>}, {pipeline_mode = #tpu.pipeline_mode<synchronous>, transform_indices = @transform_4, window_bounds = array<i64: 256, 256>}, {pipeline_mode = #tpu.pipeline_mode<synchronous>, transform_indices = @transform_5, window_bounds = array<i64: 1, 256>}, {pipeline_mode = #tpu.pipeline_mode<synchronous>, transform_indices = @transform_6, window_bounds = array<i64: 1, 32>}, {pipeline_mode = #tpu.pipeline_mode<synchronous>, transform_indices = @transform_7, window_bounds = array<i64: 1, 1>}, {transform_indices = @transform_8, window_bounds = array<i64: 8, 1>}]} {
    %c0 = arith.constant 0 : index
    %c0_0 = arith.constant 0 : index
    %0 = vector.load %arg1[%c0, %c0_0] : memref<8x1350xf32, #tpu.memory_space<vmem>>, vector<8x1350xf32>
    %1 = arith.truncf %0 : vector<8x1350xf32> to vector<8x1350xbf16>
    %c0_1 = arith.constant 0 : index
    %c0_2 = arith.constant 0 : index
    %2 = vector.load %arg3[%c0_1, %c0_2] : memref<1350x256xbf16, #tpu.memory_space<vmem>>, vector<1350x256xbf16>
    %cst = arith.constant dense<0.000000e+00> : vector<8x256xf32>
    %3 = tpu.matmul %1, %2, %cst {dimension_numbers = #tpu.dot_dimension_numbers<[1], [0], [0], [1], [0, 0, 1, 1], [], []>} : vector<8x1350xbf16>, vector<1350x256xbf16>, vector<8x256xf32> -> vector<8x256xf32>
    %c0_3 = arith.constant 0 : index
    %c0_4 = arith.constant 0 : index
    %4 = vector.load %arg4[%c0_3, %c0_4] : memref<1x256xf32, #tpu.memory_space<vmem>>, vector<1x256xf32>
    %5 = vector.broadcast %4 : vector<1x256xf32> to vector<8x256xf32>
    %6 = arith.addf %3, %5 : vector<8x256xf32>
    %cst_5 = arith.constant 0.000000e+00 : f32
    %7 = vector.broadcast %cst_5 : f32 to vector<8x256xf32>
    %8 = arith.cmpf ogt, %6, %7 : vector<8x256xf32>
    %cst_6 = arith.constant 0.00999999977 : f32
    %9 = vector.broadcast %cst_6 : f32 to vector<8x256xf32>
    %10 = arith.mulf %9, %6 : vector<8x256xf32>
    %11 = arith.select %8, %6, %10 : vector<8x256xi1>, vector<8x256xf32>
    %12 = arith.truncf %11 : vector<8x256xf32> to vector<8x256xbf16>
    %c0_7 = arith.constant 0 : index
    %c0_8 = arith.constant 0 : index
    %13 = vector.load %arg5[%c0_7, %c0_8] : memref<256x256xbf16, #tpu.memory_space<vmem>>, vector<256x256xbf16>
    %cst_9 = arith.constant dense<0.000000e+00> : vector<8x256xf32>
    %14 = tpu.matmul %12, %13, %cst_9 {dimension_numbers = #tpu.dot_dimension_numbers<[1], [0], [0], [1], [0, 0, 1, 1], [], []>} : vector<8x256xbf16>, vector<256x256xbf16>, vector<8x256xf32> -> vector<8x256xf32>
    %c0_10 = arith.constant 0 : index
    %c0_11 = arith.constant 0 : index
    %15 = vector.load %arg6[%c0_10, %c0_11] : memref<1x256xf32, #tpu.memory_space<vmem>>, vector<1x256xf32>
    %16 = vector.broadcast %15 : vector<1x256xf32> to vector<8x256xf32>
    %17 = arith.addf %14, %16 : vector<8x256xf32>
    %18 = vector.extract_strided_slice %17 {offsets = [0, 0], sizes = [8, 128], strides = [1, 1]} : vector<8x256xf32> to vector<8x128xf32>
    %19 = math.absf %18 : vector<8x128xf32>
    %20 = vector.extract_strided_slice %17 {offsets = [0, 128], sizes = [8, 32], strides = [1, 1]} : vector<8x256xf32> to vector<8x32xf32>
    %21 = vector.extract_strided_slice %17 {offsets = [0, 160], sizes = [8, 32], strides = [1, 1]} : vector<8x256xf32> to vector<8x32xf32>
    %22 = math.absf %21 : vector<8x32xf32>
    %23 = vector.extract_strided_slice %17 {offsets = [0, 192], sizes = [8, 32], strides = [1, 1]} : vector<8x256xf32> to vector<8x32xf32>
    %cst_12 = arith.constant 0.000000e+00 : f32
    %24 = vector.broadcast %cst_12 : f32 to vector<8x32xf32>
    %25 = arith.cmpf ogt, %23, %24 : vector<8x32xf32>
    %cst_13 = arith.constant 0.00999999977 : f32
    %26 = vector.broadcast %cst_13 : f32 to vector<8x32xf32>
    %27 = arith.mulf %26, %23 : vector<8x32xf32>
    %28 = arith.select %25, %23, %27 : vector<8x32xi1>, vector<8x32xf32>
    %c0_14 = arith.constant 0 : index
    %c0_15 = arith.constant 0 : index
    %29 = vector.load %arg2[%c0_14, %c0_15] : memref<8x4xf32, #tpu.memory_space<vmem>>, vector<8x4xf32>
    %30 = vector.extract_strided_slice %29 {offsets = [0, 0], sizes = [8, 1], strides = [1, 1]} : vector<8x4xf32> to vector<8x1xf32>
    %31 = vector.extract_strided_slice %19 {offsets = [0, 0], sizes = [8, 32], strides = [1, 1]} : vector<8x128xf32> to vector<8x32xf32>
    %32 = vector.broadcast %30 : vector<8x1xf32> to vector<8x32xf32>
    %33 = arith.mulf %32, %31 : vector<8x32xf32>
    %34 = arith.addf %20, %33 : vector<8x32xf32>
    %35 = vector.extract_strided_slice %29 {offsets = [0, 1], sizes = [8, 1], strides = [1, 1]} : vector<8x4xf32> to vector<8x1xf32>
    %36 = vector.extract_strided_slice %19 {offsets = [0, 32], sizes = [8, 32], strides = [1, 1]} : vector<8x128xf32> to vector<8x32xf32>
    %37 = vector.broadcast %35 : vector<8x1xf32> to vector<8x32xf32>
    %38 = arith.mulf %37, %36 : vector<8x32xf32>
    %39 = arith.addf %34, %38 : vector<8x32xf32>
    %40 = vector.extract_strided_slice %29 {offsets = [0, 2], sizes = [8, 1], strides = [1, 1]} : vector<8x4xf32> to vector<8x1xf32>
    %41 = vector.extract_strided_slice %19 {offsets = [0, 64], sizes = [8, 32], strides = [1, 1]} : vector<8x128xf32> to vector<8x32xf32>
    %42 = vector.broadcast %40 : vector<8x1xf32> to vector<8x32xf32>
    %43 = arith.mulf %42, %41 : vector<8x32xf32>
    %44 = arith.addf %39, %43 : vector<8x32xf32>
    %45 = vector.extract_strided_slice %29 {offsets = [0, 3], sizes = [8, 1], strides = [1, 1]} : vector<8x4xf32> to vector<8x1xf32>
    %46 = vector.extract_strided_slice %19 {offsets = [0, 96], sizes = [8, 32], strides = [1, 1]} : vector<8x128xf32> to vector<8x32xf32>
    %47 = vector.broadcast %45 : vector<8x1xf32> to vector<8x32xf32>
    %48 = arith.mulf %47, %46 : vector<8x32xf32>
    %49 = arith.addf %44, %48 : vector<8x32xf32>
    %cst_16 = arith.constant 0.000000e+00 : f32
    %50 = vector.broadcast %cst_16 : f32 to vector<8x32xf32>
    %51 = arith.cmpf ogt, %49, %50 : vector<8x32xf32>
    %cst_17 = arith.constant 0.000000e+00 : f32
    %52 = vector.broadcast %cst_17 : f32 to vector<8x32xf32>
    %53 = arith.minimumf %49, %52 : vector<8x32xf32>
    %54 = math.exp %53 : vector<8x32xf32>
    %cst_18 = arith.constant 1.000000e+00 : f32
    %55 = vector.broadcast %cst_18 : f32 to vector<8x32xf32>
    %56 = arith.subf %54, %55 : vector<8x32xf32>
    %57 = arith.select %51, %49, %56 : vector<8x32xi1>, vector<8x32xf32>
    %58 = arith.mulf %57, %22 : vector<8x32xf32>
    %c0_19 = arith.constant 0 : index
    %c0_20 = arith.constant 0 : index
    %59 = vector.load %arg7[%c0_19, %c0_20] : memref<1x32xf32, #tpu.memory_space<vmem>>, vector<1x32xf32>
    %60 = vector.broadcast %59 : vector<1x32xf32> to vector<8x32xf32>
    %61 = arith.mulf %28, %60 : vector<8x32xf32>
    %62 = arith.addf %58, %61 : vector<8x32xf32>
    %cst_21 = arith.constant dense<0.000000e+00> : vector<8xf32>
    %63 = vector.multi_reduction <add>, %62, %cst_21 [1] : vector<8x32xf32> to vector<8xf32>
    %64 = vector.shape_cast %63 : vector<8xf32> to vector<8x1xf32>
    %c0_22 = arith.constant 0 : index
    %c0_23 = arith.constant 0 : index
    %65 = vector.load %arg8[%c0_22, %c0_23] : memref<1x1xf32, #tpu.memory_space<vmem>>, vector<1x1xf32>
    %66 = vector.broadcast %65 : vector<1x1xf32> to vector<8x1xf32>
    %67 = arith.addf %64, %66 : vector<8x1xf32>
    %c0_24 = arith.constant 0 : index
    %c0_25 = arith.constant 0 : index
    %68 = vector.load %arg9[%c0_24, %c0_25] : memref<8x1xf32, #tpu.memory_space<vmem>>, vector<8x1xf32>
    tpu.vector_store %arg9[%c0_24, %c0_25], %67 {strides = array<i32>} : memref<8x1xf32, #tpu.memory_space<vmem>>, vector<8x1xf32>,
    return
  }
  func.func @transform_0(%arg0: i32) -> (i32, i32) {
    %c0_i32 = arith.constant 0 : i32
    %c0_i32_0 = arith.constant 0 : i32
    return %arg0, %c0_i32 : i32, i32
  }
  func.func @transform_1(%arg0: i32) -> (i32, i32) {
    %c0_i32 = arith.constant 0 : i32
    %c0_i32_0 = arith.constant 0 : i32
    return %arg0, %c0_i32 : i32, i32
  }
  func.func @transform_2(%arg0: i32) -> (i32, i32) {
    %c0_i32 = arith.constant 0 : i32
    %c0_i32_0 = arith.constant 0 : i32
    %c0_i32_1 = arith.constant 0 : i32
    return %c0_i32, %c0_i32_0 : i32, i32
  }
  func.func @transform_3(%arg0: i32) -> (i32, i32) {
    %c0_i32 = arith.constant 0 : i32
    %c0_i32_0 = arith.constant 0 : i32
    %c0_i32_1 = arith.constant 0 : i32
    return %c0_i32, %c0_i32_0 : i32, i32
  }
  func.func @transform_4(%arg0: i32) -> (i32, i32) {
    %c0_i32 = arith.constant 0 : i32
    %c0_i32_0 = arith.constant 0 : i32
    %c0_i32_1 = arith.constant 0 : i32
    return %c0_i32, %c0_i32_0 : i32, i32
  }
  func.func @transform_5(%arg0: i32) -> (i32, i32) {
    %c0_i32 = arith.constant 0 : i32
    %c0_i32_0 = arith.constant 0 : i32
    %c0_i32_1 = arith.constant 0 : i32
    return %c0_i32, %c0_i32_0 : i32, i32
  }
  func.func @transform_6(%arg0: i32) -> (i32, i32) {
    %c0_i32 = arith.constant 0 : i32
    %c0_i32_0 = arith.constant 0 : i32
    %c0_i32_1 = arith.constant 0 : i32
    return %c0_i32, %c0_i32_0 : i32, i32
  }
  func.func @transform_7(%arg0: i32) -> (i32, i32) {
    %c0_i32 = arith.constant 0 : i32
    %c0_i32_0 = arith.constant 0 : i32
    %c0_i32_1 = arith.constant 0 : i32
    return %c0_i32, %c0_i32_0 : i32, i32
  }
  func.func @transform_8(%arg0: i32) -> (i32, i32) {
    %c0_i32 = arith.constant 0 : i32
    %c0_i32_0 = arith.constant 0 : i32
    return %arg0, %c0_i32 : i32, i32
  }
}

</mosaic_0001>

<bundles_post_ra>
// kernel: tpu_custom_call.1
= control target key start
LH: loop header
LB: loop body
LE: loop exit
PB: predicated region body
PF: predicated region fallthrough
CT: control target
= control target key end

     0   :  { %s3015_s0 = inlined_call_operand.hbm [shape: f32[8,1350], index: 0, kind: input, shape index: {}]   ;;  %s3016_s1 = inlined_call_operand.vmem [shape: f32[8,4], index: 1, kind: input, shape index: {}]   ;;  %s3017_s2 = inlined_call_operand.hbm [shape: bf16[1350,256], index: 2, kind: input, shape index: {}]   ;;  %s3018_s3 = inlined_call_operand.vmem [shape: f32[1,256], index: 3, kind: input, shape index: {}]   ;;  %s3019_s4 = inlined_call_operand.hbm [shape: bf16[256,256], index: 4, kind: input, shape index: {}]   ;;  %s3020_s5 = inlined_call_operand.vmem [shape: f32[1,256], index: 5, kind: input, shape index: {}]   ;;  %s3021_s6 = inlined_call_operand.vmem [shape: f32[1,32], index: 6, kind: input, shape index: {}]   ;;  %s3022_s7 = inlined_call_operand.<no memory space> [shape: f32[1,1], index: 7, kind: input, shape index: {}]   ;;  %s3023_s8 = inlined_call_operand.vmem [shape: f32[8,1], index: 8, kind: output, shape index: {}]  }
   0x1   :  { %v13_v0 = vstv %s3022_s7 }
   0x2   :  { %14 = vst [vmem:[#allocation2] sm:$0x1] %v13_v0 }
   0x3   :  { %15 = vsyncpa [#allocation4], 0 }
   0x4   :  { %16 = vsyncpa [#allocation6], 0  ;;  %s34_s9 = sshll.u32 %s3017_s2, 4  ;;  %s2857_s10 = smov [#allocation5]   ;;  %s35_s9 = int_to_ptr.hbm [resolvable:$true] %s34_s9 }
   0x5   :  { %s36_s11 = sshll.u32 %s2857_s10, 4  ;;  %s22_s14 = sshll.u32 %s3015_s0, 4  ;;  %s37_s11 = int_to_ptr.vmem [resolvable:$true] %s36_s11  ;;  %s23_s14 = int_to_ptr.hbm [resolvable:$true] %s22_s14 }
   0x6   :  { %s2858_s15 = smov 128   ;;  %s2859_s16 = smov 8  }
   0x7   :  { %42 = dma.hbm_to_vmem [thread:$0]  %s35_s9, 21632, %s37_s11, [#allocation6], %s2858_s15, %s2858_s15, %s2859_s16  }
   0x8   :  { %s2860_s7 = smov [#allocation3]   ;;  %s49_s20 = sshll.u32 %s3019_s4, 4  ;;  %s50_s20 = int_to_ptr.hbm [resolvable:$true] %s49_s20 }
   0x9   :  { %s24_s17 = sshll.u32 %s2860_s7, 4  ;;  %s2861_s2 = smov [#allocation7]   ;;  %s25_s17 = int_to_ptr.vmem [resolvable:$true] %s24_s17 }
   0xa   :  { %27 = dma.hbm_to_vmem [thread:$0]  %s23_s14, 1408, %s25_s17, [#allocation4]  }
   0xb   :  { %s51_s21 = sshll.u32 %s2861_s2, 4  ;;  %s52_s21 = int_to_ptr.vmem [resolvable:$true] %s51_s21 }
   0xc   :  { %57 = dma.hbm_to_vmem [thread:$0]  %s50_s20, 4096, %s52_s21, [#allocation6], %s2858_s15, %s2858_s15, %s2859_s16  }
   0xd   :  { %2853 = dma.done.wait [#allocation4], 1408  }
   0xe   :  { %2854 = vsyncadd [#allocation4], 4294965888 }
   0xf   :  { %2855 = dma.done.wait [#allocation6], 25728  }
  0x10   :  { %2856 = vsyncadd [#allocation6], 4294941568  ;;  %v1815_v1 = vld [vmem:[#allocation5 + $0x70] sm:$0xf]  ;;  %v2575_v2 = vld [vmem:[#allocation5 + $0x74] sm:$0xf0] }
  0x11   :  { %v1943_v3 = vld [vmem:[#allocation5 + $0x170] sm:$0xf]  ;;  %v1816_v4 = vor.u32 %v2575_v2, %v1815_v1  ;;  %v2607_v5 = vld [vmem:[#allocation5 + $0x174] sm:$0xf0]  ;;  %v1807_v12 = vld [vmem:[#allocation5 + $0x60] sm:$0xf] }
  0x12   :  { %v2007_v6 = vld [vmem:[#allocation5 + $0x1f0] sm:$0xf]  ;;  %v2623_v7 = vld [vmem:[#allocation5 + $0x1f4] sm:$0xf0]  ;;  %v1944_v8 = vor.u32 %v2607_v5, %v1943_v3  ;;  %v2573_v14 = vld [vmem:[#allocation5 + $0x64] sm:$0xf0] }
  0x13   :  { %v2008_v9 = vor.u32 %v2623_v7, %v2007_v6  ;;  %v1879_v10 = vld [vmem:[#allocation5 + $0xf0] sm:$0xf]  ;;  %v2591_v11 = vld [vmem:[#allocation5 + $0xf4] sm:$0xf0]  ;;  %1130 = vmatpush.bf16.msra.mxu0 %v1816_v4  ;;  %v1935_v15 = vld [vmem:[#allocation5 + $0x160] sm:$0xf]  ;;  %v1808_v17 = vor.u32 %v2573_v14, %v1807_v12 }
  0x14   :  { %v1880_v13 = vor.u32 %v2591_v11, %v1879_v10  ;;  %v2605_v16 = vld [vmem:[#allocation5 + $0x164] sm:$0xf0]  ;;  %1156 = vmatpush.bf16.msra.mxu2 %v1944_v8  ;;  %v1999_v19 = vld [vmem:[#allocation5 + $0x1e0] sm:$0xf]  ;;  %v1799_v24 = vld [vmem:[#allocation5 + $0x50] sm:$0xf] }
  0x15   :  { %1169 = vmatpush.bf16.msra.mxu3 %v2008_v9  ;;  %v1936_v18 = vor.u32 %v2605_v16, %v1935_v15  ;;  %v2621_v20 = vld [vmem:[#allocation5 + $0x1e4] sm:$0xf0]  ;;  %v1871_v21 = vld [vmem:[#allocation5 + $0xe0] sm:$0xf]  ;;  %v2571_v25 = vld [vmem:[#allocation5 + $0x54] sm:$0xf0] }
  0x16   :  { %1143 = vmatpush.bf16.msra.mxu1 %v1880_v13  ;;  %v2000_v22 = vor.u32 %v2621_v20, %v1999_v19  ;;  %v2589_v23 = vld [vmem:[#allocation5 + $0xe4] sm:$0xf0]  ;;  %v1927_v27 = vld [vmem:[#allocation5 + $0x150] sm:$0xf]  ;;  %v2603_v28 = vld [vmem:[#allocation5 + $0x154] sm:$0xf0]  ;;  %v1800_v30 = vor.u32 %v2571_v25, %v1799_v24 }
  0x17   :  { %v1872_v26 = vor.u32 %v2589_v23, %v1871_v21  ;;  %v1991_v29 = vld [vmem:[#allocation5 + $0x1d0] sm:$0xf]  ;;  %1131 = vmatpush.bf16.msra.mxu0 %v1808_v17  ;;  %v2619_v31 = vld [vmem:[#allocation5 + $0x1d4] sm:$0xf0]  ;;  %v1928_v34 = vor.u32 %v2603_v28, %v1927_v27  ;;  %v1791_v36 = vld [vmem:[#allocation5 + $0x40] sm:$0xf] }
  0x18   :  { %v1863_v32 = vld [vmem:[#allocation5 + $0xd0] sm:$0xf]  ;;  %v2587_v33 = vld [vmem:[#allocation5 + $0xd4] sm:$0xf0]  ;;  %1157 = vmatpush.bf16.msra.mxu2 %v1936_v18  ;;  %v1992_v35 = vor.u32 %v2619_v31, %v1991_v29  ;;  %v2569_v37 = vld [vmem:[#allocation5 + $0x44] sm:$0xf0] }
  0x19   :  { %1170 = vmatpush.bf16.msra.mxu3 %v2000_v22  ;;  %v1919_v38 = vld [vmem:[#allocation5 + $0x140] sm:$0xf]  ;;  %v1864_v39 = vor.u32 %v2587_v33, %v1863_v32  ;;  %v2601_v40 = vld [vmem:[#allocation5 + $0x144] sm:$0xf0]  ;;  %v1792_v45 = vor.u32 %v2569_v37, %v1791_v36  ;;  %v1783_v48 = vld [vmem:[#allocation5 + $0x30] sm:$0xf] }
  0x1a   :  { %1144 = vmatpush.bf16.msra.mxu1 %v1872_v26  ;;  %v1983_v41 = vld [vmem:[#allocation5 + $0x1c0] sm:$0xf]  ;;  %v2617_v42 = vld [vmem:[#allocation5 + $0x1c4] sm:$0xf0]  ;;  %v1920_v46 = vor.u32 %v2601_v40, %v1919_v38  ;;  %v2567_v49 = vld [vmem:[#allocation5 + $0x34] sm:$0xf0] }
  0x1b   :  { %v1855_v43 = vld [vmem:[#allocation5 + $0xc0] sm:$0xf]  ;;  %v2585_v44 = vld [vmem:[#allocation5 + $0xc4] sm:$0xf0]  ;;  %1132 = vmatpush.bf16.msra.mxu0 %v1800_v30  ;;  %v1984_v47 = vor.u32 %v2617_v42, %v1983_v41  ;;  %v1911_v50 = vld [vmem:[#allocation5 + $0x130] sm:$0xf]  ;;  %v1784_v57 = vor.u32 %v2567_v49, %v1783_v48 }
  0x1c   :  { %1158 = vmatpush.bf16.msra.mxu2 %v1928_v34  ;;  %v1856_v51 = vor.u32 %v2585_v44, %v1855_v43  ;;  %v2599_v52 = vld [vmem:[#allocation5 + $0x134] sm:$0xf0]  ;;  %v1975_v53 = vld [vmem:[#allocation5 + $0x1b0] sm:$0xf]  ;;  %v1775_v60 = vld [vmem:[#allocation5 + $0x20] sm:$0xf] }
  0x1d   :  { %1171 = vmatpush.bf16.msra.mxu3 %v1992_v35  ;;  %v2615_v54 = vld [vmem:[#allocation5 + $0x1b4] sm:$0xf0]  ;;  %v1847_v55 = vld [vmem:[#allocation5 + $0xb0] sm:$0xf]  ;;  %v1912_v58 = vor.u32 %v2599_v52, %v1911_v50  ;;  %v2565_v61 = vld [vmem:[#allocation5 + $0x24] sm:$0xf0] }
  0x1e   :  { %1145 = vmatpush.bf16.msra.mxu1 %v1864_v39  ;;  %v2583_v56 = vld [vmem:[#allocation5 + $0xb4] sm:$0xf0]  ;;  %v1976_v59 = vor.u32 %v2615_v54, %v1975_v53  ;;  %v1903_v62 = vld [vmem:[#allocation5 + $0x120] sm:$0xf]  ;;  %v2597_v0 = vld [vmem:[#allocation5 + $0x124] sm:$0xf0]  ;;  %v1776_v5 = vor.u32 %v2565_v61, %v1775_v60 }
  0x1f   :  { %1133 = vmatpush.bf16.msra.mxu0 %v1792_v45  ;;  %v1848_v63 = vor.u32 %v2583_v56, %v1847_v55  ;;  %v1967_v1 = vld [vmem:[#allocation5 + $0x1a0] sm:$0xf]  ;;  %v2613_v2 = vld [vmem:[#allocation5 + $0x1a4] sm:$0xf0]  ;;  %v1904_v6 = vor.u32 %v2597_v0, %v1903_v62  ;;  %v1767_v8 = vld [vmem:[#allocation5 + $0x10] sm:$0xf] }
  0x20   :  { %1159 = vmatpush.bf16.msra.mxu2 %v1920_v46  ;;  %v1839_v3 = vld [vmem:[#allocation5 + $0xa0] sm:$0xf]  ;;  %v2581_v4 = vld [vmem:[#allocation5 + $0xa4] sm:$0xf0]  ;;  %v1968_v7 = vor.u32 %v2613_v2, %v1967_v1  ;;  %v2563_v9 = vld [vmem:[#allocation5 + $0x14] sm:$0xf0] }
  0x21   :  { %1172 = vmatpush.bf16.msra.mxu3 %v1984_v47  ;;  %v1895_v10 = vld [vmem:[#allocation5 + $0x110] sm:$0xf]  ;;  %v1840_v11 = vor.u32 %v2581_v4, %v1839_v3  ;;  %v2595_v12 = vld [vmem:[#allocation5 + $0x114] sm:$0xf0]  ;;  %v1768_v17 = vor.u32 %v2563_v9, %v1767_v8  ;;  %v1759_v18 = vld [vmem:[#allocation5] sm:$0xf] }
  0x22   :  { %1146 = vmatpush.bf16.msra.mxu1 %v1856_v51  ;;  %v1959_v13 = vld [vmem:[#allocation5 + $0x190] sm:$0xf]  ;;  %v2611_v14 = vld [vmem:[#allocation5 + $0x194] sm:$0xf0]  ;;  %v2561_v19 = vld [vmem:[#allocation5 + $0x4] sm:$0xf0]  ;;  %v1896_v20 = vor.u32 %v2595_v12, %v1895_v10 }
  0x23   :  { %1134 = vmatpush.bf16.msra.mxu0 %v1784_v57  ;;  %v1831_v15 = vld [vmem:[#allocation5 + $0x90] sm:$0xf]  ;;  %v2579_v16 = vld [vmem:[#allocation5 + $0x94] sm:$0xf0]  ;;  %v1960_v21 = vor.u32 %v2611_v14, %v1959_v13  ;;  %v1887_v22 = vld [vmem:[#allocation5 + $0x100] sm:$0xf]  ;;  %v1760_v32 = vor.u32 %v2561_v19, %v1759_v18 }
  0x24   :  { %1160 = vmatpush.bf16.msra.mxu2 %v1912_v58  ;;  %v2593_v23 = vld [vmem:[#allocation5 + $0x104] sm:$0xf0]  ;;  %v1951_v24 = vld [vmem:[#allocation5 + $0x180] sm:$0xf]  ;;  %v1832_v25 = vor.u32 %v2579_v16, %v1831_v15  ;;  %v2071_v27 = vld [vmem:[#allocation5 + $0x270] sm:$0xf] }
  0x25   :  { %1173 = vmatpush.bf16.msra.mxu3 %v1976_v59  ;;  %v2609_v26 = vld [vmem:[#allocation5 + $0x184] sm:$0xf0]  ;;  %v2639_v28 = vld [vmem:[#allocation5 + $0x274] sm:$0xf0]  ;;  %v2199_v29 = vld [vmem:[#allocation5 + $0x370] sm:$0xf]  ;;  %v1888_v36 = vor.u32 %v2593_v23, %v1887_v22 }
  0x26   :  { %1147 = vmatpush.bf16.msra.mxu1 %v1848_v63  ;;  %v2671_v30 = vld [vmem:[#allocation5 + $0x374] sm:$0xf0]  ;;  %v2263_v31 = vld [vmem:[#allocation5 + $0x3f0] sm:$0xf]  ;;  %v1823_v34 = vld [vmem:[#allocation5 + $0x80] sm:$0xf]  ;;  %v1952_v37 = vor.u32 %v2609_v26, %v1951_v24  ;;  %v2072_v40 = vor.u32 %v2639_v28, %v2071_v27 }
  0x27   :  { %1135 = vmatpush.bf16.msra.mxu0 %v1776_v5  ;;  %v2687_v33 = vld [vmem:[#allocation5 + $0x3f4] sm:$0xf0]  ;;  %v2577_v35 = vld [vmem:[#allocation5 + $0x84] sm:$0xf0]  ;;  %v2135_v38 = vld [vmem:[#allocation5 + $0x2f0] sm:$0xf]  ;;  %v2200_v41 = vor.u32 %v2671_v30, %v2199_v29 }
  0x28   :  { %1161 = vmatpush.bf16.msra.mxu2 %v1904_v6  ;;  %v2655_v39 = vld [vmem:[#allocation5 + $0x2f4] sm:$0xf0]  ;;  %v2063_v42 = vld [vmem:[#allocation5 + $0x260] sm:$0xf]  ;;  %v2264_v43 = vor.u32 %v2687_v33, %v2263_v31  ;;  %v1824_v44 = vor.u32 %v2577_v35, %v1823_v34  ;;  %v2637_v45 = vld [vmem:[#allocation5 + $0x264] sm:$0xf0] }
  0x29   :  { %1174 = vmatpush.bf16.msra.mxu3 %v1968_v7  ;;  %v2191_v46 = vld [vmem:[#allocation5 + $0x360] sm:$0xf]  ;;  %v2669_v47 = vld [vmem:[#allocation5 + $0x364] sm:$0xf0]  ;;  %v2136_v48 = vor.u32 %v2655_v39, %v2135_v38  ;;  %v2064_v53 = vor.u32 %v2637_v45, %v2063_v42  ;;  %v2055_v55 = vld [vmem:[#allocation5 + $0x250] sm:$0xf] }
  0x2a   :  { %1148 = vmatpush.bf16.msra.mxu1 %v1840_v11  ;;  %v2255_v49 = vld [vmem:[#allocation5 + $0x3e0] sm:$0xf]  ;;  %v2685_v50 = vld [vmem:[#allocation5 + $0x3e4] sm:$0xf0]  ;;  %v2192_v54 = vor.u32 %v2669_v47, %v2191_v46  ;;  %v2635_v57 = vld [vmem:[#allocation5 + $0x254] sm:$0xf0] }
  0x2b   :  { %1136 = vmatpush.bf16.msra.mxu0 %v1768_v17  ;;  %v2127_v51 = vld [vmem:[#allocation5 + $0x2e0] sm:$0xf]  ;;  %v2653_v52 = vld [vmem:[#allocation5 + $0x2e4] sm:$0xf0]  ;;  %v2256_v56 = vor.u32 %v2685_v50, %v2255_v49  ;;  %v2183_v58 = vld [vmem:[#allocation5 + $0x350] sm:$0xf]  ;;  %v2056_v2 = vor.u32 %v2635_v57, %v2055_v55 }
  0x2c   :  { %1162 = vmatpush.bf16.msra.mxu2 %v1896_v20  ;;  %v2667_v59 = vld [vmem:[#allocation5 + $0x354] sm:$0xf0]  ;;  %v2128_v60 = vor.u32 %v2653_v52, %v2127_v51  ;;  %v2247_v61 = vld [vmem:[#allocation5 + $0x3d0] sm:$0xf]  ;;  %v2047_v4 = vld [vmem:[#allocation5 + $0x240] sm:$0xf] }
  0x2d   :  { %1175 = vmatpush.bf16.msra.mxu3 %v1960_v21  ;;  %v2683_v62 = vld [vmem:[#allocation5 + $0x3d4] sm:$0xf0]  ;;  %v2119_v63 = vld [vmem:[#allocation5 + $0x2d0] sm:$0xf]  ;;  %v2184_v3 = vor.u32 %v2667_v59, %v2183_v58  ;;  %v2633_v5 = vld [vmem:[#allocation5 + $0x244] sm:$0xf0] }
  0x2e   :  { %1149 = vmatpush.bf16.msra.mxu1 %v1832_v25  ;;  %v2651_v0 = vld [vmem:[#allocation5 + $0x2d4] sm:$0xf0]  ;;  %v77_v7 = vld [vmem:[#allocation3] sm:$0xff]  ;;  %v2248_v8 = vor.u32 %v2683_v62, %v2247_v61  ;;  %v2175_v9 = vld [vmem:[#allocation5 + $0x340] sm:$0xf]  ;;  %v2048_v20 = vor.u32 %v2633_v5, %v2047_v4  ;;  %vm1123_vm0 = vcmask 1042432  }
  0x2f   :  { %1137 = vmatpush.bf16.msra.mxu0 %v1760_v32  ;;  %v79_v1 = vld [vmem:[#allocation3 + $0x10] sm:$0xff]  ;;  %v2665_v10 = vld [vmem:[#allocation5 + $0x344] sm:$0xf0]  ;;  %v2928_v11 = vpack.c.bf16 %v77_v7, %v77_v7  ;;  %v80_v12 = vld [vmem:[#allocation3 + $0x18] sm:$0xff]  ;;  %v2120_v13 = vor.u32 %v2651_v0, %v2119_v63  ;;  %vm1119_vm1 = vcmask 572416   ;;  %s2867_s26 = smov 96  }
  0x30   :  { %1163 = vmatpush.bf16.msra.mxu2 %v1888_v36  ;;  %v2926_v6 = vpack.c.bf16 %v79_v1, %v79_v1  ;;  %v2239_v14 = vld [vmem:[#allocation5 + $0x3c0] sm:$0xf]  ;;  %v2681_v15 = vld [vmem:[#allocation5 + $0x3c4] sm:$0xf0]  ;;  %v2931_v16 = vpack.c.bf16 %v80_v12, %v80_v12  ;;  %v78_v19 = vld [vmem:[#allocation3 + $0x8] sm:$0xff]  ;;  %v2176_v21 = vor.u32 %v2665_v10, %v2175_v9  ;;  %vm1740_vm6 = vcmask 261120  }
  0x31   :  { %1176 = vmatpush.bf16.msra.mxu3 %v1952_v37  ;;  %v2111_v17 = vld [vmem:[#allocation5 + $0x2c0] sm:$0xf]  ;;  %v2649_v18 = vld [vmem:[#allocation5 + $0x2c4] sm:$0xf0]  ;;  %v2039_v22 = vld [vmem:[#allocation5 + $0x230] sm:$0xf]  ;;  %v2934_v23 = vpack.c.bf16 %v78_v19, %v78_v19  ;;  %v2240_v24 = vor.u32 %v2681_v15, %v2239_v14 }
  0x32   :  { %1150 = vmatpush.bf16.msra.mxu1 %v1824_v44  ;;  %1138 = vmatmul.bf16.vlgmr.msra.gmra.mxu0 %v2928_v11  ;;  %v2631_v25 = vld [vmem:[#allocation5 + $0x234] sm:$0xf0]  ;;  %v2167_v26 = vld [vmem:[#allocation5 + $0x330] sm:$0xf]  ;;  %v2112_v28 = vor.u32 %v2649_v18, %v2111_v17  ;;  %v2031_v35 = vld [vmem:[#allocation5 + $0x220] sm:$0xf] }
  0x33   :  { %1182 = vmatpush.bf16.msrb.mxu0 %v2072_v40  ;;  %1164 = vmatmul.bf16.vlgmr.msra.gmra.mxu2 %v2926_v6  ;;  %v2663_v27 = vld [vmem:[#allocation5 + $0x334] sm:$0xf0]  ;;  %v2231_v29 = vld [vmem:[#allocation5 + $0x3b0] sm:$0xf]  ;;  %v2040_v33 = vor.u32 %v2631_v25, %v2039_v22  ;;  %v2629_v37 = vld [vmem:[#allocation5 + $0x224] sm:$0xf0] }
  0x34   :  { %1208 = vmatpush.bf16.msrb.mxu2 %v2200_v41  ;;  %v2679_v30 = vld [vmem:[#allocation5 + $0x3b4] sm:$0xf0]  ;;  %1177 = vmatmul.bf16.vlgmr.msra.gmra.mxu3 %v2931_v16  ;;  %v2103_v31 = vld [vmem:[#allocation5 + $0x2b0] sm:$0xf]  ;;  %v2168_v34 = vor.u32 %v2663_v27, %v2167_v26  ;;  %v2159_v38 = vld [vmem:[#allocation5 + $0x320] sm:$0xf]  ;;  %v2032_v45 = vor.u32 %v2629_v37, %v2031_v35 }
  0x35   :  { %1221 = vmatpush.bf16.msrb.mxu3 %v2264_v43  ;;  %v2647_v32 = vld [vmem:[#allocation5 + $0x2b4] sm:$0xf0]  ;;  %1151 = vmatmul.bf16.vlgmr.msra.gmra.mxu1 %v2934_v23  ;;  %v2232_v36 = vor.u32 %v2679_v30, %v2231_v29  ;;  %v2661_v39 = vld [vmem:[#allocation5 + $0x324] sm:$0xf0]  ;;  %v2223_v41 = vld [vmem:[#allocation5 + $0x3a0] sm:$0xf] }
  0x36   :  { %1195 = vmatpush.bf16.msrb.mxu1 %v2136_v48  ;;  %v2104_v40 = vor.u32 %v2647_v32, %v2103_v31  ;;  %v2677_v42 = vld [vmem:[#allocation5 + $0x3a4] sm:$0xf0]  ;;  %v2095_v43 = vld [vmem:[#allocation5 + $0x2a0] sm:$0xf]  ;;  %v2160_v46 = vor.u32 %v2661_v39, %v2159_v38  ;;  %v2023_v47 = vld [vmem:[#allocation5 + $0x210] sm:$0xf] }
  0x37   :  { %1183 = vmatpush.bf16.msrb.mxu0 %v2064_v53  ;;  %v2645_v44 = vld [vmem:[#allocation5 + $0x2a4] sm:$0xf0]  ;;  %v2938_v48 = vld [vmem:[#allocation5 + $0x540] sm:$0x77]  ;;  %v2224_v49 = vor.u32 %v2677_v42, %v2223_v41  ;;  %v2627_v50 = vld [vmem:[#allocation5 + $0x214] sm:$0xf0] }
  0x38   :  { %1209 = vmatpush.bf16.msrb.mxu2 %v2192_v54  ;;  %v2151_v51 = vld [vmem:[#allocation5 + $0x310] sm:$0xf]  ;;  %v2659_v52 = vld [vmem:[#allocation5 + $0x314] sm:$0xf0]  ;;  %v2096_v53 = vor.u32 %v2645_v44, %v2095_v43  ;;  %v779_v58 = vunpack.c.l.b16 %v2938_v48  ;;  %v2024_v59 = vor.u32 %v2627_v50, %v2023_v47  ;;  %v2015_v61 = vld [vmem:[#allocation5 + $0x200] sm:$0xf] }
  0x39   :  { %1222 = vmatpush.bf16.msrb.mxu3 %v2256_v56  ;;  %v2215_v54 = vld [vmem:[#allocation5 + $0x390] sm:$0xf]  ;;  %v2675_v55 = vld [vmem:[#allocation5 + $0x394] sm:$0xf0]  ;;  %v2625_v62 = vld [vmem:[#allocation5 + $0x204] sm:$0xf0] }
  0x3a   :  { %1196 = vmatpush.bf16.msrb.mxu1 %v2128_v60  ;;  %v2087_v56 = vld [vmem:[#allocation5 + $0x290] sm:$0xf]  ;;  %v2643_v57 = vld [vmem:[#allocation5 + $0x294] sm:$0xf0]  ;;  %v2152_v60 = vor.u32 %v2659_v52, %v2151_v51  ;;  %v2143_v63 = vld [vmem:[#allocation5 + $0x300] sm:$0xf]  ;;  %v2216_v0 = vor.u32 %v2675_v55, %v2215_v54  ;;  %v949_v9 = vpack.c.b16 %v779_v58, %v779_v58  ;;  %v2016_v14 = vor.u32 %v2625_v62, %v2015_v61 }
  0x3b   :  { %1184 = vmatpush.bf16.msrb.mxu0 %v2056_v2  ;;  %v2657_v1 = vld [vmem:[#allocation5 + $0x304] sm:$0xf0]  ;;  %v2207_v2 = vld [vmem:[#allocation5 + $0x380] sm:$0xf]  ;;  %v2088_v4 = vor.u32 %v2643_v57, %v2087_v56  ;;  %v2327_v5 = vld [vmem:[#allocation5 + $0x470] sm:$0xf] }
  0x3c   :  { %1210 = vmatpush.bf16.msrb.mxu2 %v2184_v3  ;;  %v2673_v3 = vld [vmem:[#allocation5 + $0x384] sm:$0xf0]  ;;  %v2703_v7 = vld [vmem:[#allocation5 + $0x474] sm:$0xf0]  ;;  %v1817_v10 = vld [vmem:[#allocation5 + $0x78] sm:$0xf0]  ;;  %v2144_v15 = vor.u32 %v2657_v1, %v2143_v63 }
  0x3d   :  { %1223 = vmatpush.bf16.msrb.mxu3 %v2248_v8  ;;  %v2574_v8 = vld [vmem:[#allocation5 + $0x74] sm:$0xf]  ;;  %v2079_v12 = vld [vmem:[#allocation5 + $0x280] sm:$0xf]  ;;  %v2391_v17 = vld [vmem:[#allocation5 + $0x4f0] sm:$0xf] }
  0x3e   :  { %1197 = vmatpush.bf16.msrb.mxu1 %v2120_v13  ;;  %v2641_v13 = vld [vmem:[#allocation5 + $0x284] sm:$0xf0]  ;;  %v2719_v18 = vld [vmem:[#allocation5 + $0x4f4] sm:$0xf0]  ;;  %v2319_v22 = vld [vmem:[#allocation5 + $0x460] sm:$0xf]  ;;  %v1820_v26 = vor.u32 %v2574_v8, %v1817_v10 }
  0x3f   :  { %1185 = vmatpush.bf16.msrb.mxu0 %v2048_v20  ;;  %v83_v19 = vld [vmem:[#allocation3 + $0x30] sm:$0xff]  ;;  %v2208_v20 = vor.u32 %v2673_v3, %v2207_v2  ;;  %v81_v25 = vld [vmem:[#allocation3 + $0x20] sm:$0xff]  ;;  %v2423_v27 = vld [vmem:[#allocation5 + $0x530] sm:$0xf]  ;;  %v1125_v30 = vsel %vm1123_vm0, %v949_v9, 0  ;;  %v2080_v31 = vor.u32 %v2641_v13, %v2079_v12  ;;  %v2392_v35 = vor.u32 %v2719_v18, %v2391_v17 }
  0x40   :  { %1211 = vmatpush.bf16.msrb.mxu2 %v2176_v21  ;;  %v2328_v21 = vor.u32 %v2703_v7, %v2327_v5  ;;  %v84_v29 = vld [vmem:[#allocation3 + $0x38] sm:$0xff]  ;;  %v82_v37 = vld [vmem:[#allocation3 + $0x28] sm:$0xff]  ;;  %v2725_v47 = vld [vmem:[#allocation5 + $0x524] sm:$0xf0]  ;;  %vm1749_vm7 = vcmask 7168  }
  0x41   :  { %1224 = vmatpush.bf16.msrb.mxu3 %v2240_v24  ;;  %v2701_v24 = vld [vmem:[#allocation5 + $0x464] sm:$0xf0]  ;;  %v2572_v32 = vld [vmem:[#allocation5 + $0x64] sm:$0xf]  ;;  %v2383_v39 = vld [vmem:[#allocation5 + $0x4e0] sm:$0xf]  ;;  %v2946_v41 = vpack.c.bf16 %v84_v29, %v84_v29  ;;  %v2949_v51 = vpack.c.bf16 %v82_v37, %v82_v37 }
  0x42   :  { %1198 = vmatpush.bf16.msrb.mxu1 %v2112_v28  ;;  %v2727_v28 = vld [vmem:[#allocation5 + $0x534] sm:$0xf0]  ;;  %v2320_v38 = vor.u32 %v2701_v24, %v2319_v22  ;;  %v2311_v44 = vld [vmem:[#allocation5 + $0x450] sm:$0xf]  ;;  %v1801_v50 = vld [vmem:[#allocation5 + $0x58] sm:$0xf0] }
  0x43   :  { %1186 = vmatpush.bf16.msrb.mxu0 %v2040_v33  ;;  %v1809_v33 = vld [vmem:[#allocation5 + $0x68] sm:$0xf0]  ;;  %v2424_v42 = vor.u32 %v2727_v28, %v2423_v27  ;;  %v2375_v54 = vld [vmem:[#allocation5 + $0x4d0] sm:$0xf]  ;;  %v2715_v55 = vld [vmem:[#allocation5 + $0x4d4] sm:$0xf0] }
  0x44   :  { %1212 = vmatpush.bf16.msrb.mxu2 %v2168_v34  ;;  %v2942_v34 = vpack.c.bf16 %v83_v19, %v83_v19  ;;  %v1812_v43 = vor.u32 %v2572_v32, %v1809_v33  ;;  %v2303_v58 = vld [vmem:[#allocation5 + $0x440] sm:$0xf]  ;;  %v2723_v61 = vld [vmem:[#allocation5 + $0x514] sm:$0xf0]  ;;  %v2568_v62 = vld [vmem:[#allocation5 + $0x44] sm:$0xf] }
  0x45   :  { %1225 = vmatpush.bf16.msrb.mxu3 %v2232_v36  ;;  %v2944_v36 = vpack.c.bf16 %v81_v25, %v81_v25  ;;  %v1793_v63 = vld [vmem:[#allocation5 + $0x48] sm:$0xf0]  ;;  %v2367_v2 = vld [vmem:[#allocation5 + $0x4c0] sm:$0xf]  ;;  %v2713_v3 = vld [vmem:[#allocation5 + $0x4c4] sm:$0xf0] }
  0x46   :  { %1199 = vmatpush.bf16.msrb.mxu1 %v2104_v40  ;;  %v2717_v40 = vld [vmem:[#allocation5 + $0x4e4] sm:$0xf0]  ;;  %v1796_v5 = vor.u32 %v2568_v62, %v1793_v63  ;;  %v2295_v7 = vld [vmem:[#allocation5 + $0x430] sm:$0xf]  ;;  %v2695_v8 = vld [vmem:[#allocation5 + $0x434] sm:$0xf0] }
  0x47   :  { %1187 = vmatpush.bf16.msrb.mxu0 %v2032_v45  ;;  %v2699_v45 = vld [vmem:[#allocation5 + $0x454] sm:$0xf0]  ;;  %v2384_v52 = vor.u32 %v2717_v40, %v2383_v39  ;;  %v2399_v9 = vld [vmem:[#allocation5 + $0x500] sm:$0xf]  ;;  %v2721_v10 = vld [vmem:[#allocation5 + $0x504] sm:$0xf0]  ;;  %v2296_v18 = vor.u32 %v2695_v8, %v2295_v7 }
  0x48   :  { %1213 = vmatpush.bf16.msrb.mxu2 %v2160_v46  ;;  %v2415_v46 = vld [vmem:[#allocation5 + $0x520] sm:$0xf]  ;;  %v2566_v12 = vld [vmem:[#allocation5 + $0x34] sm:$0xf]  ;;  %v1785_v13 = vld [vmem:[#allocation5 + $0x38] sm:$0xf0] }
  0x49   :  { %1226 = vmatpush.bf16.msrb.mxu3 %v2224_v49  ;;  %v2570_v49 = vld [vmem:[#allocation5 + $0x54] sm:$0xf]  ;;  %v2416_v56 = vor.u32 %v2725_v47, %v2415_v46  ;;  %v1881_v17 = vld [vmem:[#allocation5 + $0xf8] sm:$0xf0]  ;;  %v2359_v19 = vld [vmem:[#allocation5 + $0x4b0] sm:$0xf]  ;;  %v1788_v22 = vor.u32 %v2566_v12, %v1785_v13 }
  0x4a   :  { %1200 = vmatpush.bf16.msrb.mxu1 %v2096_v53  ;;  %v2312_v53 = vor.u32 %v2699_v45, %v2311_v44  ;;  %v1804_v57 = vor.u32 %v2570_v49, %v1801_v50  ;;  %v2287_v24 = vld [vmem:[#allocation5 + $0x420] sm:$0xf]  ;;  %v2693_v25 = vld [vmem:[#allocation5 + $0x424] sm:$0xf0]  ;;  %v2564_v28 = vld [vmem:[#allocation5 + $0x24] sm:$0xf] }
  0x4b   :  { %1188 = vmatpush.bf16.msrb.mxu0 %v2024_v59  ;;  %v2697_v59 = vld [vmem:[#allocation5 + $0x444] sm:$0xf0]  ;;  %v1777_v29 = vld [vmem:[#allocation5 + $0x28] sm:$0xf0]  ;;  %v2288_v33 = vor.u32 %v2693_v25, %v2287_v24  ;;  %v2279_v40 = vld [vmem:[#allocation5 + $0x410] sm:$0xf] }
  0x4c   :  { %1214 = vmatpush.bf16.msrb.mxu2 %v2152_v60  ;;  %v2407_v60 = vld [vmem:[#allocation5 + $0x510] sm:$0xf]  ;;  %v2304_v1 = vor.u32 %v2697_v59, %v2303_v58  ;;  %v1873_v32 = vld [vmem:[#allocation5 + $0xe8] sm:$0xf0]  ;;  %v2709_v37 = vld [vmem:[#allocation5 + $0x4a4] sm:$0xf0]  ;;  %v1780_v39 = vor.u32 %v2564_v28, %v1777_v29 }
  0x4d   :  { %1227 = vmatpush.bf16.msrb.mxu3 %v2216_v0  ;;  %v2376_v0 = vor.u32 %v2715_v55, %v2375_v54  ;;  %v2562_v44 = vld [vmem:[#allocation5 + $0x14] sm:$0xf]  ;;  %v1769_v45 = vld [vmem:[#allocation5 + $0x18] sm:$0xf0]  ;;  %v2271_v54 = vld [vmem:[#allocation5 + $0x400] sm:$0xf] }
  0x4e   :  { %1201 = vmatpush.bf16.msrb.mxu1 %v2088_v4  ;;  %v2408_v4 = vor.u32 %v2723_v61, %v2407_v60  ;;  %v2586_v47 = vld [vmem:[#allocation5 + $0xd4] sm:$0xf]  ;;  %v1865_v49 = vld [vmem:[#allocation5 + $0xd8] sm:$0xf0]  ;;  %v1772_v55 = vor.u32 %v2562_v44, %v1769_v45  ;;  %v1761_v58 = vld [vmem:[#allocation5 + $0x8] sm:$0xf0] }
  0x4f   :  { %1189 = vmatpush.bf16.msrb.mxu0 %v2016_v14  ;;  %v2368_v14 = vor.u32 %v2713_v3, %v2367_v2  ;;  %v1868_v59 = vor.u32 %v2586_v47, %v1865_v49  ;;  %v2584_v60 = vld [vmem:[#allocation5 + $0xc4] sm:$0xf]  ;;  %v2606_v61 = vld [vmem:[#allocation5 + $0x174] sm:$0xf]  ;;  %v1945_v62 = vld [vmem:[#allocation5 + $0x178] sm:$0xf0] }
  0x50   :  { %1215 = vmatpush.bf16.msrb.mxu2 %v2144_v15  ;;  %v2590_v15 = vld [vmem:[#allocation5 + $0xf4] sm:$0xf]  ;;  %v2073_v2 = vld [vmem:[#allocation5 + $0x278] sm:$0xf0]  ;;  %v85_v7 = vld [vmem:[#allocation3 + $0x40] sm:$0xff] }
  0x51   :  { %1228 = vmatpush.bf16.msrb.mxu3 %v2208_v20  ;;  %v2711_v20 = vld [vmem:[#allocation5 + $0x4b4] sm:$0xf0]  ;;  %v1884_v27 = vor.u32 %v2590_v15, %v1881_v17  ;;  %v2009_v12 = vld [vmem:[#allocation5 + $0x1f8] sm:$0xf0]  ;;  %v2604_v15 = vld [vmem:[#allocation5 + $0x164] sm:$0xf] }
  0x52   :  { %1202 = vmatpush.bf16.msrb.mxu1 %v2080_v31  ;;  %1190 = vmatmul.bf16.vlgmr.msrb.gmra.mxu0 %v2944_v36  ;;  %v2588_v31 = vld [vmem:[#allocation5 + $0xe4] sm:$0xf]  ;;  %v1937_v17 = vld [vmem:[#allocation5 + $0x168] sm:$0xf0]  ;;  %v2618_v45 = vld [vmem:[#allocation5 + $0x1d4] sm:$0xf] }
  0x53   :  { %1234 = vmatpush.bf16.msra.mxu0 %v2328_v21  ;;  %1216 = vmatmul.bf16.vlgmr.msrb.gmra.mxu2 %v2942_v34  ;;  %v2400_v21 = vor.u32 %v2721_v10, %v2399_v9  ;;  %v1948_v9 = vor.u32 %v2606_v61, %v1945_v62  ;;  %v2622_v10 = vld [vmem:[#allocation5 + $0x1f4] sm:$0xf]  ;;  %v2636_v25 = vld [vmem:[#allocation5 + $0x264] sm:$0xf]  ;;  %v2001_v29 = vld [vmem:[#allocation5 + $0x1e8] sm:$0xf0] }
  0x54   :  { %1263 = vmatpush.bf16.msra.mxu2 %v1125_v30  ;;  %1229 = vmatmul.bf16.vlgmr.msrb.gmra.mxu3 %v2946_v41  ;;  %v2360_v30 = vor.u32 %v2711_v20, %v2359_v19  ;;  %v2958_v19 = vpack.c.bf16 %v85_v7, %v85_v7  ;;  %v86_v20 = vld [vmem:[#allocation3 + $0x48] sm:$0xff]  ;;  %v2012_v24 = vor.u32 %v2622_v10, %v2009_v12  ;;  %v2620_v28 = vld [vmem:[#allocation5 + $0x1e4] sm:$0xf]  ;;  %v1913_v62 = vld [vmem:[#allocation5 + $0x138] sm:$0xf0] }
  0x55   :  { %1273 = vmatpush.bf16.msra.mxu3 %v1820_v26  ;;  %1203 = vmatmul.bf16.vlgmr.msrb.gmra.mxu1 %v2949_v51  ;;  %v87_v26 = vld [vmem:[#allocation3 + $0x50] sm:$0xff]  ;;  %v2600_v49 = vld [vmem:[#allocation5 + $0x144] sm:$0xf]  ;;  %v2598_v61 = vld [vmem:[#allocation5 + $0x134] sm:$0xf] }
  0x56   :  { %1247 = vmatpush.bf16.msra.mxu1 %v2392_v35  ;;  %v2351_v35 = vld [vmem:[#allocation5 + $0x4a0] sm:$0xf]  ;;  %v2137_v7 = vld [vmem:[#allocation5 + $0x2f8] sm:$0xf0] }
  0x57   :  { %1235 = vmatpush.bf16.msra.mxu0 %v2320_v38  ;;  %v2954_v38 = vpack.c.bf16 %v87_v26, %v87_v26  ;;  %v2352_v46 = vor.u32 %v2709_v37, %v2351_v35  ;;  %v2065_v26 = vld [vmem:[#allocation5 + $0x268] sm:$0xf0]  ;;  %v1929_v35 = vld [vmem:[#allocation5 + $0x158] sm:$0xf0] }
  0x58   :  { %1264 = vmatpush.bf16.msra.mxu2 %v2424_v42  ;;  %v2691_v42 = vld [vmem:[#allocation5 + $0x414] sm:$0xf0]  ;;  %v2068_v37 = vor.u32 %v2636_v25, %v2065_v26  ;;  %v1977_v10 = vld [vmem:[#allocation5 + $0x1b8] sm:$0xf0]  ;;  %v2612_v26 = vld [vmem:[#allocation5 + $0x1a4] sm:$0xf] }
  0x59   :  { %1274 = vmatpush.bf16.msra.mxu3 %v1812_v43  ;;  %v1876_v43 = vor.u32 %v2588_v31, %v1873_v32  ;;  %v2280_v50 = vor.u32 %v2691_v42, %v2279_v40  ;;  %v2580_v32 = vld [vmem:[#allocation5 + $0xa4] sm:$0xf]  ;;  %v2004_v40 = vor.u32 %v2620_v28, %v2001_v29  ;;  %v2634_v42 = vld [vmem:[#allocation5 + $0x254] sm:$0xf]  ;;  %v1897_v29 = vld [vmem:[#allocation5 + $0x118] sm:$0xf0] }
  0x5a   :  { %1248 = vmatpush.bf16.msra.mxu1 %v2384_v52  ;;  %v2343_v52 = vld [vmem:[#allocation5 + $0x490] sm:$0xf]  ;;  %v2594_v28 = vld [vmem:[#allocation5 + $0x114] sm:$0xf] }
  0x5b   :  { %1236 = vmatpush.bf16.msra.mxu0 %v2312_v53  ;;  %v2707_v53 = vld [vmem:[#allocation5 + $0x494] sm:$0xf0] }
  0x5c   :  { %1265 = vmatpush.bf16.msra.mxu2 %v2416_v56  ;;  %v2689_v56 = vld [vmem:[#allocation5 + $0x404] sm:$0xf0]  ;;  %v2344_v63 = vor.u32 %v2707_v53, %v2343_v52  ;;  %v2578_v53 = vld [vmem:[#allocation5 + $0x94] sm:$0xf] }
  0x5d   :  { %1275 = vmatpush.bf16.msra.mxu3 %v1804_v57  ;;  %v2560_v57 = vld [vmem:[#allocation5 + $0x4] sm:$0xf]  ;;  %v2272_v3 = vor.u32 %v2689_v56, %v2271_v54  ;;  %v1833_v54 = vld [vmem:[#allocation5 + $0x98] sm:$0xf0] }
  0x5e   :  { %1249 = vmatpush.bf16.msra.mxu1 %v2376_v0  ;;  %v1857_v0 = vld [vmem:[#allocation5 + $0xc8] sm:$0xf0]  ;;  %v1764_v8 = vor.u32 %v2560_v57, %v1761_v58  ;;  %v2632_v56 = vld [vmem:[#allocation5 + $0x244] sm:$0xf] }
  0x5f   :  { %1237 = vmatpush.bf16.msra.mxu0 %v2304_v1  ;;  %v2638_v1 = vld [vmem:[#allocation5 + $0x274] sm:$0xf]  ;;  %v1860_v13 = vor.u32 %v2584_v60, %v1857_v0  ;;  %v2049_v57 = vld [vmem:[#allocation5 + $0x248] sm:$0xf0]  ;;  %v2616_v58 = vld [vmem:[#allocation5 + $0x1c4] sm:$0xf]  ;;  %v1836_v60 = vor.u32 %v2578_v53, %v1833_v54 }
  0x60   :  { %1266 = vmatpush.bf16.msra.mxu2 %v2408_v4  ;;  %v2335_v4 = vld [vmem:[#allocation5 + $0x480] sm:$0xf]  ;;  %v2576_v0 = vld [vmem:[#allocation5 + $0x84] sm:$0xf]  ;;  %v2670_v53 = vld [vmem:[#allocation5 + $0x374] sm:$0xf] }
  0x61   :  { %1276 = vmatpush.bf16.msra.mxu3 %v1796_v5  ;;  %v2705_v5 = vld [vmem:[#allocation5 + $0x484] sm:$0xf0]  ;;  %v2201_v54 = vld [vmem:[#allocation5 + $0x378] sm:$0xf0] }
  0x62   :  { %1250 = vmatpush.bf16.msra.mxu1 %v2368_v14  ;;  %v2076_v14 = vor.u32 %v2638_v1, %v2073_v2  ;;  %v1825_v1 = vld [vmem:[#allocation5 + $0x88] sm:$0xf0]  ;;  %v2630_v2 = vld [vmem:[#allocation5 + $0x234] sm:$0xf] }
  0x63   :  { %1238 = vmatpush.bf16.msra.mxu0 %v2296_v18  ;;  %v2336_v18 = vor.u32 %v2705_v5, %v2335_v4  ;;  %v2041_v4 = vld [vmem:[#allocation5 + $0x238] sm:$0xf0]  ;;  %v2654_v5 = vld [vmem:[#allocation5 + $0x2f4] sm:$0xf]  ;;  %v1828_v12 = vor.u32 %v2576_v0, %v1825_v1 }
  0x64   :  { %1267 = vmatpush.bf16.msra.mxu2 %v2400_v21  ;;  %v2582_v21 = vld [vmem:[#allocation5 + $0xb4] sm:$0xf] }
  0x65   :  { %1277 = vmatpush.bf16.msra.mxu3 %v1788_v22  ;;  %v1849_v22 = vld [vmem:[#allocation5 + $0xb8] sm:$0xf0] }
  0x66   :  { %1251 = vmatpush.bf16.msra.mxu1 %v2360_v30  ;;  %v2960_v30 = vpack.c.bf16 %v86_v20, %v86_v20  ;;  %v1852_v31 = vor.u32 %v2582_v21, %v1849_v22  ;;  %v2033_v21 = vld [vmem:[#allocation5 + $0x228] sm:$0xf0]  ;;  %v2652_v22 = vld [vmem:[#allocation5 + $0x2e4] sm:$0xf] }
  0x67   :  { %1239 = vmatpush.bf16.msra.mxu0 %v2288_v33  ;;  %2429 = vmatmul.msk.bf16.vlgmr.msra.gmra.mxu2 %vm1119_vm1, %v2954_v38  ;;  %v2602_v33 = vld [vmem:[#allocation5 + $0x154] sm:$0xf] }
  0x68   :  { %1286 = vmatpush.bf16.msrb.mxu2 %v1884_v27  ;;  %v1940_v27 = vor.u32 %v2604_v15, %v1937_v17  ;;  %v1932_v44 = vor.u32 %v2602_v33, %v1929_v35  ;;  %v2044_v15 = vor.u32 %v2630_v2, %v2041_v4  ;;  %v2140_v17 = vor.u32 %v2654_v5, %v2137_v7  ;;  %v2626_v33 = vld [vmem:[#allocation5 + $0x214] sm:$0xf]  ;;  %v2668_v2 = vld [vmem:[#allocation5 + $0x364] sm:$0xf] }
  0x69   :  { %1278 = vmatpush.bf16.msra.mxu3 %v1780_v39  ;;  %v1841_v39 = vld [vmem:[#allocation5 + $0xa8] sm:$0xf0]  ;;  %v2646_v7 = vld [vmem:[#allocation5 + $0x2b4] sm:$0xf] }
  0x6a   :  { %1252 = vmatpush.bf16.msra.mxu1 %v2352_v46  ;;  %v1993_v46 = vld [vmem:[#allocation5 + $0x1d8] sm:$0xf0]  ;;  %v1844_v47 = vor.u32 %v2580_v32, %v1841_v39  ;;  %v2650_v39 = vld [vmem:[#allocation5 + $0x2d4] sm:$0xf] }
  0x6b   :  { %1240 = vmatpush.bf16.msra.mxu0 %v2280_v50  ;;  %v1921_v50 = vld [vmem:[#allocation5 + $0x148] sm:$0xf0] }
  0x6c   :  { %1287 = vmatpush.bf16.msrb.mxu2 %v1876_v43  ;;  %v2057_v43 = vld [vmem:[#allocation5 + $0x258] sm:$0xf0] }
  0x6d   :  { %1279 = vmatpush.bf16.msra.mxu3 %v1772_v55  ;;  %v2060_v52 = vor.u32 %v2634_v42, %v2057_v43  ;;  %v1996_v55 = vor.u32 %v2618_v45, %v1993_v46  ;;  %v1900_v42 = vor.u32 %v2594_v28, %v1897_v29  ;;  %v2610_v43 = vld [vmem:[#allocation5 + $0x194] sm:$0xf]  ;;  %v2592_v45 = vld [vmem:[#allocation5 + $0x104] sm:$0xf]  ;;  %v1889_v46 = vld [vmem:[#allocation5 + $0x108] sm:$0xf0] }
  0x6e   :  { %1253 = vmatpush.bf16.msra.mxu1 %v2344_v63  ;;  %v2052_v63 = vor.u32 %v2632_v56, %v2049_v57  ;;  %v2648_v56 = vld [vmem:[#allocation5 + $0x2c4] sm:$0xf]  ;;  %v2113_v57 = vld [vmem:[#allocation5 + $0x2c8] sm:$0xf0]  ;;  %v2682_v29 = vld [vmem:[#allocation5 + $0x3d4] sm:$0xf] }
  0x6f   :  { %1241 = vmatpush.bf16.msra.mxu0 %v2272_v3  ;;  %v2116_v1 = vor.u32 %v2648_v56, %v2113_v57  ;;  %v2718_v56 = vld [vmem:[#allocation5 + $0x4f4] sm:$0xf]  ;;  %v2393_v57 = vld [vmem:[#allocation5 + $0x4f8] sm:$0xf0] }
  0x70   :  { %1288 = vmatpush.bf16.msrb.mxu2 %v1868_v59  ;;  %v1985_v59 = vld [vmem:[#allocation5 + $0x1c8] sm:$0xf0] }
  0x71   :  { %1280 = vmatpush.bf16.msra.mxu3 %v1764_v8  ;;  %v1988_v3 = vor.u32 %v2616_v58, %v1985_v59  ;;  %v1916_v8 = vor.u32 %v2598_v61, %v1913_v62  ;;  %v1892_v58 = vor.u32 %v2592_v45, %v1889_v46  ;;  %v2329_v59 = vld [vmem:[#allocation5 + $0x478] sm:$0xf0]  ;;  %v2204_v61 = vor.u32 %v2670_v53, %v2201_v54  ;;  %v2686_v62 = vld [vmem:[#allocation5 + $0x3f4] sm:$0xf]  ;;  %v2680_v45 = vld [vmem:[#allocation5 + $0x3c4] sm:$0xf] }
  0x72   :  { %1254 = vmatpush.bf16.msra.mxu1 %v2336_v18  ;;  %1242 = vmatmul.bf16.vlgmr.msra.gmra.mxu0 %v2958_v19  ;;  %v2628_v18 = vld [vmem:[#allocation5 + $0x224] sm:$0xf]  ;;  %v2241_v46 = vld [vmem:[#allocation5 + $0x3c8] sm:$0xf0]  ;;  %v2694_v53 = vld [vmem:[#allocation5 + $0x434] sm:$0xf] }
  0x73   :  { %1299 = vmatpush.bf16.msrb.mxu0 %v1948_v9  ;;  %v2614_v9 = vld [vmem:[#allocation5 + $0x1b4] sm:$0xf]  ;;  %v2244_v54 = vor.u32 %v2680_v45, %v2241_v46  ;;  %v2425_v45 = vld [vmem:[#allocation5 + $0x538] sm:$0xf0] }
  0x74   :  { %1289 = vmatpush.bf16.msrb.mxu2 %v1860_v13  ;;  %1281 = vmatmul.bf16.vlgmr.msra.gmra.mxu3 %v2928_v11  ;;  %v1924_v11 = vor.u32 %v2600_v49, %v1921_v50  ;;  %v2596_v13 = vld [vmem:[#allocation5 + $0x124] sm:$0xf]  ;;  %v1980_v20 = vor.u32 %v2614_v9, %v1977_v10 }
  0x75   :  { %1325 = vmatpush.bf16.msrb.mxu3 %v2076_v14  ;;  %1255 = vmatmul.bf16.vlgmr.msra.gmra.mxu1 %v2960_v30  ;;  %v1905_v14 = vld [vmem:[#allocation5 + $0x128] sm:$0xf0]  ;;  %v2700_v10 = vld [vmem:[#allocation5 + $0x464] sm:$0xf] }
  0x76   :  { %1312 = vmatpush.bf16.msrb.mxu1 %v2012_v24  ;;  %v2129_v24 = vld [vmem:[#allocation5 + $0x2e8] sm:$0xf0]  ;;  %v1908_v25 = vor.u32 %v2596_v13, %v1905_v14  ;;  %v2684_v14 = vld [vmem:[#allocation5 + $0x3e4] sm:$0xf] }
  0x77   :  { %1300 = vmatpush.bf16.msrb.mxu0 %v1940_v27  ;;  %v1969_v27 = vld [vmem:[#allocation5 + $0x1a8] sm:$0xf0]  ;;  %v2132_v32 = vor.u32 %v2652_v22, %v2129_v24  ;;  %v2644_v22 = vld [vmem:[#allocation5 + $0x2a4] sm:$0xf] }
  0x78   :  { %1290 = vmatpush.bf16.msrb.mxu2 %v1852_v31  ;;  %v2036_v31 = vor.u32 %v2628_v18, %v2033_v21  ;;  %v1972_v35 = vor.u32 %v2612_v26, %v1969_v27  ;;  %v2666_v18 = vld [vmem:[#allocation5 + $0x354] sm:$0xf]  ;;  %v2097_v24 = vld [vmem:[#allocation5 + $0x2a8] sm:$0xf0]  ;;  %v2313_v27 = vld [vmem:[#allocation5 + $0x458] sm:$0xf0] }
  0x79   :  { %1326 = vmatpush.bf16.msrb.mxu3 %v2068_v37  ;;  %v2025_v37 = vld [vmem:[#allocation5 + $0x218] sm:$0xf0]  ;;  %v2698_v26 = vld [vmem:[#allocation5 + $0x454] sm:$0xf] }
  0x7a   :  { %1313 = vmatpush.bf16.msrb.mxu1 %v2004_v40  ;;  %v2121_v40 = vld [vmem:[#allocation5 + $0x2d8] sm:$0xf0]  ;;  %v2028_v49 = vor.u32 %v2626_v33, %v2025_v37  ;;  %v2664_v33 = vld [vmem:[#allocation5 + $0x344] sm:$0xf]  ;;  %v2316_v37 = vor.u32 %v2698_v26, %v2313_v27  ;;  %v2145_v27 = vld [vmem:[#allocation5 + $0x308] sm:$0xf0] }
  0x7b   :  { %1301 = vmatpush.bf16.msrb.mxu0 %v1932_v44  ;;  %v1961_v44 = vld [vmem:[#allocation5 + $0x198] sm:$0xf0]  ;;  %v2124_v50 = vor.u32 %v2650_v39, %v2121_v40  ;;  %v2642_v39 = vld [vmem:[#allocation5 + $0x294] sm:$0xf]  ;;  %v2656_v26 = vld [vmem:[#allocation5 + $0x304] sm:$0xf] }
  0x7c   :  { %1291 = vmatpush.bf16.msrb.mxu2 %v1844_v47  ;;  %v2624_v47 = vld [vmem:[#allocation5 + $0x204] sm:$0xf]  ;;  %v2089_v40 = vld [vmem:[#allocation5 + $0x298] sm:$0xf0] }
  0x7d   :  { %1327 = vmatpush.bf16.msrb.mxu3 %v2060_v52  ;;  %v2017_v52 = vld [vmem:[#allocation5 + $0x208] sm:$0xf0] }
  0x7e   :  { %1314 = vmatpush.bf16.msrb.mxu1 %v1996_v55  ;;  %v1964_v55 = vor.u32 %v2610_v43, %v1961_v44  ;;  %v2020_v0 = vor.u32 %v2624_v47, %v2017_v52  ;;  %v2696_v43 = vld [vmem:[#allocation5 + $0x444] sm:$0xf]  ;;  %v2662_v47 = vld [vmem:[#allocation5 + $0x334] sm:$0xf] }
  0x7f   :  { %1302 = vmatpush.bf16.msrb.mxu0 %v1924_v11  ;;  %v2702_v11 = vld [vmem:[#allocation5 + $0x474] sm:$0xf]  ;;  %v2640_v52 = vld [vmem:[#allocation5 + $0x284] sm:$0xf] }
  0x80   :  { %1292 = vmatpush.bf16.msrb.mxu2 %v1836_v60  ;;  %v2608_v60 = vld [vmem:[#allocation5 + $0x184] sm:$0xf]  ;;  %v2332_v4 = vor.u32 %v2702_v11, %v2329_v59  ;;  %v2233_v59 = vld [vmem:[#allocation5 + $0x3b8] sm:$0xf0] }
  0x81   :  { %1328 = vmatpush.bf16.msrb.mxu3 %v2052_v63  ;;  %v2265_v63 = vld [vmem:[#allocation5 + $0x3f8] sm:$0xf0] }
  0x82   :  { %1315 = vmatpush.bf16.msrb.mxu1 %v1988_v3  ;;  %v2193_v3 = vld [vmem:[#allocation5 + $0x368] sm:$0xf0]  ;;  %v2268_v9 = vor.u32 %v2686_v62, %v2265_v63  ;;  %v2396_v63 = vor.u32 %v2718_v56, %v2393_v57  ;;  %v2722_v57 = vld [vmem:[#allocation5 + $0x514] sm:$0xf] }
  0x83   :  { %1303 = vmatpush.bf16.msrb.mxu0 %v1916_v8  ;;  %v2105_v8 = vld [vmem:[#allocation5 + $0x2b8] sm:$0xf0]  ;;  %v2196_v13 = vor.u32 %v2668_v2, %v2193_v3  ;;  %v2289_v2 = vld [vmem:[#allocation5 + $0x428] sm:$0xf0]  ;;  %v2716_v3 = vld [vmem:[#allocation5 + $0x4e4] sm:$0xf] }
  0x84   :  { %1293 = vmatpush.bf16.msrb.mxu2 %v1828_v12  ;;  %v2321_v12 = vld [vmem:[#allocation5 + $0x468] sm:$0xf0] }
  0x85   :  { %1329 = vmatpush.bf16.msrb.mxu3 %v2044_v15  ;;  %v2257_v15 = vld [vmem:[#allocation5 + $0x3e8] sm:$0xf0]  ;;  %v2324_v21 = vor.u32 %v2700_v10, %v2321_v12  ;;  %v2153_v10 = vld [vmem:[#allocation5 + $0x318] sm:$0xf0] }
  0x86   :  { %1316 = vmatpush.bf16.msrb.mxu1 %v1980_v20  ;;  %v2185_v20 = vld [vmem:[#allocation5 + $0x358] sm:$0xf0] }
  0x87   :  { %1304 = vmatpush.bf16.msrb.mxu0 %v1908_v25  ;;  %1294 = vmatmul.bf16.vlgmr.msrb.gmra.mxu2 %v2934_v23  ;;  %v1953_v23 = vld [vmem:[#allocation5 + $0x188] sm:$0xf0]  ;;  %v2260_v25 = vor.u32 %v2684_v14, %v2257_v15  ;;  %v2188_v28 = vor.u32 %v2666_v18, %v2185_v20  ;;  %v2690_v14 = vld [vmem:[#allocation5 + $0x414] sm:$0xf]  ;;  %v780_v15 = vunpack.c.h.b16 %v2938_v48  ;;  %v2281_v18 = vld [vmem:[#allocation5 + $0x418] sm:$0xf0] }
  0x88   :  { %1338 = vmatpush.bf16.msra.mxu2 %v2140_v17  ;;  %v1956_v5 = vor.u32 %v2608_v60, %v1953_v23  ;;  %v2108_v17 = vor.u32 %v2646_v7, %v2105_v8  ;;  %v2660_v23 = vld [vmem:[#allocation5 + $0x324] sm:$0xf]  ;;  %v2225_v8 = vld [vmem:[#allocation5 + $0x3a8] sm:$0xf0]  ;;  %v2714_v20 = vld [vmem:[#allocation5 + $0x4d4] sm:$0xf] }
  0x89   :  { %1330 = vmatpush.bf16.msrb.mxu3 %v2036_v31  ;;  %v2249_v31 = vld [vmem:[#allocation5 + $0x3d8] sm:$0xf0]  ;;  %v2676_v7 = vld [vmem:[#allocation5 + $0x3a4] sm:$0xf] }
  0x8a   :  { %1317 = vmatpush.bf16.msrb.mxu1 %v1972_v35  ;;  %v2177_v35 = vld [vmem:[#allocation5 + $0x348] sm:$0xf0] }
  0x8b   :  { %1305 = vmatpush.bf16.msrb.mxu0 %v1900_v42  ;;  %v2252_v42 = vor.u32 %v2682_v29, %v2249_v31  ;;  %v2180_v44 = vor.u32 %v2664_v33, %v2177_v35  ;;  %v2688_v31 = vld [vmem:[#allocation5 + $0x404] sm:$0xf]  ;;  %v2273_v33 = vld [vmem:[#allocation5 + $0x408] sm:$0xf0] }
  0x8c   :  { %1339 = vmatpush.bf16.msra.mxu2 %v2132_v32  ;;  %v2100_v32 = vor.u32 %v2644_v22, %v2097_v24  ;;  %v2674_v24 = vld [vmem:[#allocation5 + $0x394] sm:$0xf]  ;;  %v2712_v35 = vld [vmem:[#allocation5 + $0x4c4] sm:$0xf] }
  0x8d   :  { %1331 = vmatpush.bf16.msrb.mxu3 %v2028_v49  ;;  %v2169_v49 = vld [vmem:[#allocation5 + $0x338] sm:$0xf0] }
  0x8e   :  { %1318 = vmatpush.bf16.msrb.mxu1 %v1964_v55  ;;  %v2297_v55 = vld [vmem:[#allocation5 + $0x438] sm:$0xf0]  ;;  %v2172_v11 = vor.u32 %v2662_v47, %v2169_v49 }
  0x8f   :  { %1306 = vmatpush.bf16.msrb.mxu0 %v1892_v58  ;;  %v2678_v58 = vld [vmem:[#allocation5 + $0x3b4] sm:$0xf]  ;;  %v2300_v62 = vor.u32 %v2694_v53, %v2297_v55  ;;  %v2361_v47 = vld [vmem:[#allocation5 + $0x4b8] sm:$0xf0]  ;;  %v2708_v53 = vld [vmem:[#allocation5 + $0x4a4] sm:$0xf] }
  0x90   :  { %1340 = vmatpush.bf16.msra.mxu2 %v2124_v50 }
  0x91   :  { %1332 = vmatpush.bf16.msrb.mxu3 %v2020_v0  ;;  %v2692_v0 = vld [vmem:[#allocation5 + $0x424] sm:$0xf] }
  0x92   :  { %1319 = vmatpush.bf16.msrb.mxu1 %v1956_v5  ;;  %1307 = vmatmul.bf16.vlgmr.msrb.gmra.mxu0 %v2926_v6  ;;  %v2305_v6 = vld [vmem:[#allocation5 + $0x448] sm:$0xf0]  ;;  %v2292_v12 = vor.u32 %v2692_v0, %v2289_v2  ;;  %v2743_v2 = vld [vmem:[#allocation7 + $0x74] sm:$0xf0] }
  0x93   :  { %1351 = vmatpush.bf16.msra.mxu0 %v2204_v61  ;;  %v2308_v50 = vor.u32 %v2696_v43, %v2305_v6  ;;  %v2161_v61 = vld [vmem:[#allocation5 + $0x328] sm:$0xf0] }
  0x94   :  { %1341 = vmatpush.bf16.msra.mxu2 %v2116_v1  ;;  %1333 = vmatmul.bf16.vlgmr.msrb.gmra.mxu3 %v2944_v36  ;;  %v2092_v36 = vor.u32 %v2642_v39, %v2089_v40  ;;  %v2236_v1 = vor.u32 %v2678_v58, %v2233_v59  ;;  %v2164_v5 = vor.u32 %v2660_v23, %v2161_v61  ;;  %v2672_v40 = vld [vmem:[#allocation5 + $0x384] sm:$0xf]  ;;  %v2706_v58 = vld [vmem:[#allocation5 + $0x494] sm:$0xf]  ;;  %v2345_v59 = vld [vmem:[#allocation5 + $0x498] sm:$0xf0] }
  0x95   :  { %1377 = vmatpush.bf16.msra.mxu3 %v2332_v4  ;;  %1320 = vmatmul.bf16.vlgmr.msrb.gmra.mxu1 %v2931_v16  ;;  %v2081_v16 = vld [vmem:[#allocation5 + $0x288] sm:$0xf0]  ;;  %v2148_v39 = vor.u32 %v2656_v26, %v2145_v27  ;;  %v2348_v23 = vor.u32 %v2706_v58, %v2345_v59  ;;  %v2720_v61 = vld [vmem:[#allocation5 + $0x504] sm:$0xf]  ;;  %v2465_v26 = vld [vmem:[#allocation7 + $0x40] sm:$0xf] }
  0x96   :  { %1364 = vmatpush.bf16.msra.mxu1 %v2268_v9  ;;  %v2084_v60 = vor.u32 %v2640_v52, %v2081_v16  ;;  %v2385_v4 = vld [vmem:[#allocation5 + $0x4e8] sm:$0xf0]  ;;  %v2658_v9 = vld [vmem:[#allocation5 + $0x314] sm:$0xf]  ;;  %v2724_v52 = vld [vmem:[#allocation5 + $0x524] sm:$0xf] }
  0x97   :  { %1352 = vmatpush.bf16.msra.mxu0 %v2196_v13  ;;  %v2388_v13 = vor.u32 %v2716_v3, %v2385_v4  ;;  %v2156_v22 = vor.u32 %v2658_v9, %v2153_v10  ;;  %v2417_v16 = vld [vmem:[#allocation5 + $0x528] sm:$0xf0]  ;;  %v2491_v4 = vld [vmem:[#allocation7 + $0x78] sm:$0xf0]  ;;  %v2741_v9 = vld [vmem:[#allocation7 + $0x64] sm:$0xf0] }
  0x98   :  { %1342 = vmatpush.bf16.msra.mxu2 %v2108_v17  ;;  %v2228_v17 = vor.u32 %v2676_v7, %v2225_v8  ;;  %v2420_v55 = vor.u32 %v2724_v52, %v2417_v16  ;;  %v2481_v8 = vld [vmem:[#allocation7 + $0x60] sm:$0xf]  ;;  %v2740_v10 = vld [vmem:[#allocation7 + $0x64] sm:$0xf]  ;;  %v2737_v27 = vld [vmem:[#allocation7 + $0x44] sm:$0xf0] }
  0x99   :  { %1378 = vmatpush.bf16.msra.mxu3 %v2324_v21  ;;  %v2377_v21 = vld [vmem:[#allocation5 + $0x4d8] sm:$0xf0] }
  0x9a   :  { %1365 = vmatpush.bf16.msra.mxu1 %v2260_v25  ;;  %v2217_v25 = vld [vmem:[#allocation5 + $0x398] sm:$0xf0]  ;;  %v2380_v29 = vor.u32 %v2714_v20, %v2377_v21  ;;  %v2475_v20 = vld [vmem:[#allocation7 + $0x58] sm:$0xf0] }
  0x9b   :  { %1353 = vmatpush.bf16.msra.mxu0 %v2188_v28  ;;  %v2284_v28 = vor.u32 %v2690_v14, %v2281_v18  ;;  %v2220_v48 = vor.u32 %v2674_v24, %v2217_v25  ;;  %v2473_v14 = vld [vmem:[#allocation7 + $0x50] sm:$0xf]  ;;  %v2738_v18 = vld [vmem:[#allocation7 + $0x54] sm:$0xf] }
  0x9c   :  { %1343 = vmatpush.bf16.msra.mxu2 %v2100_v32  ;;  %v950_v32 = vpack.c.b16 %v780_v15, %v780_v15  ;;  %v2739_v15 = vld [vmem:[#allocation7 + $0x54] sm:$0xf0]  ;;  %v2478_v25 = vor.u32 %v2738_v18, %v2475_v20 }
  0x9d   :  { %1379 = vmatpush.bf16.msra.mxu3 %v2316_v37  ;;  %v2369_v37 = vld [vmem:[#allocation5 + $0x4c8] sm:$0xf0] }
  0x9e   :  { %1366 = vmatpush.bf16.msra.mxu1 %v2252_v42  ;;  %v2276_v42 = vor.u32 %v2688_v31, %v2273_v33  ;;  %v2372_v43 = vor.u32 %v2712_v35, %v2369_v37  ;;  %v1128_v6 = vsel %vm1123_vm0, %v950_v32, 0  ;;  %v2466_v32 = vor.u32 %v2737_v27, %v2465_v26  ;;  %v2457_v33 = vld [vmem:[#allocation7 + $0x30] sm:$0xf]  ;;  %v2735_v35 = vld [vmem:[#allocation7 + $0x34] sm:$0xf0] }
  0x9f   :  { %1354 = vmatpush.bf16.msra.mxu0 %v2180_v44  ;;  %v2726_v44 = vld [vmem:[#allocation5 + $0x534] sm:$0xf]  ;;  %v2734_v37 = vld [vmem:[#allocation7 + $0x34] sm:$0xf] }
  0xa0   :  { %1344 = vmatpush.bf16.msra.mxu2 %v2092_v36  ;;  %v2710_v36 = vld [vmem:[#allocation5 + $0x4b4] sm:$0xf]  ;;  %v2428_v49 = vor.u32 %v2726_v44, %v2425_v45  ;;  %v2449_v45 = vld [vmem:[#allocation7 + $0x20] sm:$0xf] }
  0xa1   :  { %1380 = vmatpush.bf16.msra.mxu3 %v2308_v50  ;;  %v2364_v50 = vor.u32 %v2710_v36, %v2361_v47  ;;  %v2732_v36 = vld [vmem:[#allocation7 + $0x24] sm:$0xf] }
  0xa2   :  { %1367 = vmatpush.bf16.msra.mxu1 %v2244_v54  ;;  %v2353_v54 = vld [vmem:[#allocation5 + $0x4a8] sm:$0xf0] }
  0xa3   :  { %1355 = vmatpush.bf16.msra.mxu0 %v2172_v11  ;;  %v2356_v56 = vor.u32 %v2708_v53, %v2353_v54  ;;  %v2409_v11 = vld [vmem:[#allocation5 + $0x518] sm:$0xf0]  ;;  %v2441_v53 = vld [vmem:[#allocation7 + $0x10] sm:$0xf]  ;;  %v2731_v54 = vld [vmem:[#allocation7 + $0x14] sm:$0xf0] }
  0xa4   :  { %1345 = vmatpush.bf16.msra.mxu2 %v2084_v60  ;;  %v2412_v60 = vor.u32 %v2722_v57, %v2409_v11  ;;  %v2443_v57 = vld [vmem:[#allocation7 + $0x18] sm:$0xf0] }
  0xa5   :  { %1381 = vmatpush.bf16.msra.mxu3 %v2300_v62  ;;  %v2704_v62 = vld [vmem:[#allocation5 + $0x484] sm:$0xf] }
  0xa6   :  { %1368 = vmatpush.bf16.msra.mxu1 %v2236_v1  ;;  %v2489_v1 = vld [vmem:[#allocation7 + $0x70] sm:$0xf] }
  0xa7   :  { %1356 = vmatpush.bf16.msra.mxu0 %v2164_v5  ;;  %1346 = vmatmul.bf16.vlgmr.msra.gmra.mxu2 %v2949_v51  ;;  %v2209_v51 = vld [vmem:[#allocation5 + $0x388] sm:$0xf0]  ;;  %v2490_v3 = vor.u32 %v2743_v2, %v2489_v1 }
  0xa8   :  { %1390 = vmatpush.bf16.msrb.mxu2 %v2396_v63  ;;  %v2212_v46 = vor.u32 %v2672_v40, %v2209_v51  ;;  %v2337_v63 = vld [vmem:[#allocation5 + $0x488] sm:$0xf0]  ;;  %v2458_v40 = vor.u32 %v2735_v35, %v2457_v33  ;;  %v2555_v33 = vld [vmem:[#allocation7 + $0xf8] sm:$0xf0] }
  0xa9   :  { %1382 = vmatpush.bf16.msra.mxu3 %v2292_v12  ;;  %v2340_v0 = vor.u32 %v2704_v62, %v2337_v63  ;;  %v2482_v12 = vor.u32 %v2741_v9, %v2481_v8  ;;  %v2435_v63 = vld [vmem:[#allocation7 + $0x8] sm:$0xf0] }
  0xaa   :  { %1369 = vmatpush.bf16.msra.mxu1 %v2228_v17 }
  0xab   :  { %1357 = vmatpush.bf16.msra.mxu0 %v2156_v22  ;;  %v2474_v22 = vor.u32 %v2739_v15, %v2473_v14 }
  0xac   :  { %1391 = vmatpush.bf16.msrb.mxu2 %v2388_v13  ;;  %v2483_v13 = vld [vmem:[#allocation7 + $0x68] sm:$0xf0] }
  0xad   :  { %1383 = vmatpush.bf16.msra.mxu3 %v2284_v28  ;;  %v2486_v17 = vor.u32 %v2740_v10, %v2483_v13  ;;  %v2736_v28 = vld [vmem:[#allocation7 + $0x44] sm:$0xf] }
  0xae   :  { %1370 = vmatpush.bf16.msra.mxu1 %v2220_v48 }
  0xaf   :  { %1358 = vmatpush.bf16.msra.mxu0 %v2148_v39  ;;  %v1139_v7 = vpop.f32.mrf.mxu0 }
  0xb0   :  { %1392 = vmatpush.bf16.msrb.mxu2 %v2380_v29  ;;  %v2467_v29 = vld [vmem:[#allocation7 + $0x48] sm:$0xf0] }
  0xb1   :  { %1384 = vmatpush.bf16.msra.mxu3 %v2276_v42 }
  0xb2   :  { %1371 = vmatpush.bf16.msra.mxu1 %v2212_v46  ;;  %1359 = vmatmul.bf16.vlgmr.msra.gmra.mxu0 %v2942_v34  ;;  %v2401_v34 = vld [vmem:[#allocation5 + $0x508] sm:$0xf0]  ;;  %v1152_v21 = vpop.f32.mrf.mxu1  ;;  %v2733_v46 = vld [vmem:[#allocation7 + $0x24] sm:$0xf0] }
  0xb3   :  { %1406 = vmatpush.bf16.msrb.mxu0 %v1128_v6  ;;  %v2450_v47 = vor.u32 %v2733_v46, %v2449_v45  ;;  %v2537_v46 = vld [vmem:[#allocation7 + $0xd0] sm:$0xf] }
  0xb4   :  { %1393 = vmatpush.bf16.msrb.mxu2 %v2372_v43  ;;  %1385 = vmatmul.bf16.vlgmr.msra.gmra.mxu3 %v2958_v19  ;;  %v2404_v19 = vor.u32 %v2720_v61, %v2401_v34  ;;  %v2981_v43 = vld [vmem:[%s3018_s3] sm:$0x3]  ;;  %v2728_v61 = vld [vmem:[#allocation7 + $0x4] sm:$0xf] }
  0xb5   :  { %1372 = vmatmul.bf16.vlgmr.msra.gmra.mxu1 %v2946_v41  ;;  %v2742_v41 = vld [vmem:[#allocation7 + $0x74] sm:$0xf]  ;;  %v270_v44 = vperm.slane %v2981_v43, 0 }
  0xb6   :  { %v2494_v5 = vor.u32 %v2742_v41, %v2491_v4  ;;  %1622 = vmatpush.bf16.msrb.mxu1 %v2490_v3  ;;  %v1165_v24 = vpop.f32.mrf.mxu2 }
  0xb7   :  { %1407 = vmatpush.bf16.msrb.mxu0 %v2428_v49  ;;  %v1141_v31 = vpop.f32.mrf.mxu0  ;;  %v1178_v48 = vpop.f32.mrf.mxu3  ;;  %v2451_v49 = vld [vmem:[#allocation7 + $0x28] sm:$0xf0]  ;;  %v1140_v52 = vadd.f32 %v1139_v7, %v270_v44 }
  0xb8   :  { %1394 = vmatpush.bf16.msrb.mxu2 %v2364_v50  ;;  %v2454_v50 = vor.u32 %v2732_v36, %v2451_v49  ;;  %v2553_v31 = vld [vmem:[#allocation7 + $0xf0] sm:$0xf]  ;;  %v2547_v44 = vld [vmem:[#allocation7 + $0xe8] sm:$0xf0]  ;;  %v2755_v36 = vld [vmem:[#allocation7 + $0xd4] sm:$0xf0] }
  0xb9   :  { %v1153_v58 = vadd.f32 %v1152_v21, %v1140_v52  ;;  %v2538_v49 = vor.u32 %v2755_v36, %v2537_v46  ;;  %v2529_v52 = vld [vmem:[#allocation7 + $0xc0] sm:$0xf] }
  0xba   :  { %1623 = vmatpush.bf16.msrb.mxu1 %v2482_v12  ;;  %v1154_v39 = vpop.f32.mrf.mxu1 }
  0xbb   :  { %1408 = vmatpush.bf16.msrb.mxu0 %v2420_v55  ;;  %v2730_v55 = vld [vmem:[#allocation7 + $0x14] sm:$0xf]  ;;  %v2757_v39 = vld [vmem:[#allocation7 + $0xe4] sm:$0xf0] }
  0xbc   :  { %1395 = vmatpush.bf16.msrb.mxu2 %v2356_v56  ;;  %v2442_v56 = vor.u32 %v2731_v54, %v2441_v53  ;;  %v2446_v11 = vor.u32 %v2730_v55, %v2443_v57  ;;  %v2752_v55 = vld [vmem:[#allocation7 + $0xc4] sm:$0xf] }
  0xbe   :  { %1624 = vmatpush.bf16.msrb.mxu1 %v2474_v22  ;;  %v1167_v51 = vpop.f32.mrf.mxu2 }
  0xbf   :  { %1409 = vmatpush.bf16.msrb.mxu0 %v2412_v60  ;;  %v1180_v6 = vpop.f32.mrf.mxu3  ;;  %v2433_v60 = vld [vmem:[#allocation7] sm:$0xf] }
  0xc0   :  { %1396 = vmatpush.bf16.msrb.mxu2 %v2348_v23  ;;  %v2729_v23 = vld [vmem:[#allocation7 + $0x4] sm:$0xf0] }
  0xc1   :  { %v2434_v62 = vor.u32 %v2729_v23, %v2433_v60  ;;  %v2521_v60 = vld [vmem:[#allocation7 + $0xb0] sm:$0xf]  ;;  %v2751_v23 = vld [vmem:[#allocation7 + $0xb4] sm:$0xf0] }
  0xc2   :  { %1625 = vmatpush.bf16.msrb.mxu1 %v2466_v32  ;;  %v2759_v32 = vld [vmem:[#allocation7 + $0xf4] sm:$0xf0] }
  0xc3   :  { %1410 = vmatpush.bf16.msrb.mxu0 %v2404_v19  ;;  %v2438_v19 = vor.u32 %v2728_v61, %v2435_v63  ;;  %v2750_v61 = vld [vmem:[#allocation7 + $0xb4] sm:$0xf]  ;;  %v2513_v63 = vld [vmem:[#allocation7 + $0xa0] sm:$0xf] }
  0xc4   :  { %1397 = vmatpush.bf16.msrb.mxu2 %v2340_v0  ;;  %v1166_v0 = vadd.f32 %v1165_v24, %v1153_v58 }
  0xc6   :  { %2430 = vmatmul.msk.bf16.vlgmr.msrb.gmra.mxu0 %vm1119_vm1, %v2954_v38  ;;  %v2470_v38 = vor.u32 %v2736_v28, %v2467_v29  ;;  %1626 = vmatpush.bf16.msrb.mxu1 %v2458_v40  ;;  %v1179_v41 = vadd.f32 %v1178_v48, %v1166_v0  ;;  %v2758_v48 = vld [vmem:[#allocation7 + $0xf4] sm:$0xf]  ;;  %v2756_v40 = vld [vmem:[#allocation7 + $0xe4] sm:$0xf]  ;;  %v271_v0 = vperm.slane %v2981_v43, 1 }
  0xc7   :  { %1648 = vmatpush.bf16.msra.mxu0 %v2494_v5  ;;  %1398 = vmatmul.bf16.vlgmr.msrb.gmra.mxu2 %v2960_v30  ;;  %v2459_v30 = vld [vmem:[#allocation7 + $0x38] sm:$0xf0]  ;;  %v2558_v35 = vor.u32 %v2758_v48, %v2555_v33  ;;  %v2550_v45 = vor.u32 %v2756_v40, %v2547_v44  ;;  %v2863_v48 = vmov 3  }
  0xc8   :  { %v2462_v42 = vor.u32 %v2734_v37, %v2459_v30  ;;  %v2545_v30 = vld [vmem:[#allocation7 + $0xe0] sm:$0xf]  ;;  %2774 = vset.pattern.permute.xlu1 %v2863_v48 }
  0xc9   :  { %1661 = vmatpush.bf16.msra.mxu2 %v2558_v35  ;;  %v2546_v6 = vor.u32 %v2757_v39, %v2545_v30  ;;  %v2777_v30 = vld [vmem:[%s3021_s6] ss:$0 sm:$0xff] }
  0xca   :  { %1627 = vmatpush.bf16.msrb.mxu1 %v2450_v47  ;;  %v2754_v47 = vld [vmem:[#allocation7 + $0xd4] sm:$0xf] }
  0xcb   :  { %1649 = vmatpush.bf16.msra.mxu0 %v2486_v17 }
  0xcd   :  { %1662 = vmatpush.bf16.msra.mxu2 %v2550_v45 }
  0xce   :  { %1628 = vmatpush.bf16.msrb.mxu1 %v2442_v56  ;;  %v2531_v56 = vld [vmem:[#allocation7 + $0xc8] sm:$0xf0] }
  0xcf   :  { %1650 = vmatpush.bf16.msra.mxu0 %v2478_v25  ;;  %v1191_v16 = vpop.f32.mrf.mxu0  ;;  %v2534_v58 = vor.u32 %v2752_v55, %v2531_v56 }
  0xd0   :  { %v1192_v5 = vadd.f32 %v1191_v16, %v1179_v41  ;;  %v2753_v16 = vld [vmem:[#allocation7 + $0xc4] sm:$0xf0]  ;;  %v2748_v41 = vld [vmem:[#allocation7 + $0xa4] sm:$0xf] }
  0xd2   :  { %v1204_v59 = vpop.f32.mrf.mxu1  ;;  %1629 = vmatpush.bf16.msrb.mxu1 %v2434_v62  ;;  %v2523_v62 = vld [vmem:[#allocation7 + $0xb8] sm:$0xf0] }
  0xd3   :  { %1651 = vmatpush.bf16.msra.mxu0 %v2470_v38  ;;  %v1205_v8 = vadd.f32 %v1204_v59, %v1192_v5  ;;  %v2554_v38 = vor.u32 %v2759_v32, %v2553_v31  ;;  %v2862_v32 = vmov 1  }
  0xd4   :  { %2772 = vset.pattern.permute.xlu0 %v2862_v32 }
  0xd5   :  { %1635 = vmatpush.bf16.msrb.mxu3 %v2554_v38  ;;  %v2864_v38 = vmov 0  }
  0xd6   :  { %v1217_v34 = vpop.f32.mrf.mxu2  ;;  %2775 = vset.pattern.permute.xlu2 %v2864_v38 }
  0xd7   :  { %1652 = vmatpush.bf16.msra.mxu0 %v2462_v42  ;;  %v1230_v1 = vpop.f32.mrf.mxu3  ;;  %v1193_v2 = vpop.f32.mrf.mxu0  ;;  %v1218_v9 = vadd.f32 %v1217_v34, %v1205_v8  ;;  %v2522_v34 = vor.u32 %v2751_v23, %v2521_v60  ;;  %v2505_v8 = vld [vmem:[#allocation7 + $0x90] sm:$0xf] }
  0xd8   :  { %v2526_v2 = vor.u32 %v2750_v61, %v2523_v62 }
  0xd9   :  { %v1231_v12 = vadd.f32 %v1230_v1, %v1218_v9  ;;  %1636 = vmatpush.bf16.msrb.mxu3 %v2546_v6  ;;  %v2747_v9 = vld [vmem:[#allocation7 + $0x94] sm:$0xf0] }
  0xda   :  { %v1206_v3 = vpop.f32.mrf.mxu1 }
  0xdb   :  { %1653 = vmatpush.bf16.msra.mxu0 %v2454_v50  ;;  %v2539_v50 = vld [vmem:[#allocation7 + $0xd8] sm:$0xf0]  ;;  %v2515_v3 = vld [vmem:[#allocation7 + $0xa8] sm:$0xf0] }
  0xdc   :  { %v2542_v54 = vor.u32 %v2754_v47, %v2539_v50  ;;  %v2518_v5 = vor.u32 %v2748_v41, %v2515_v3 }
  0xdd   :  { %1637 = vmatpush.bf16.msrb.mxu3 %v2538_v49 }
  0xde   :  { %v1219_v4 = vpop.f32.mrf.mxu2  ;;  %1663 = vmatpush.bf16.msra.mxu2 %v2542_v54 }
  0xdf   :  { %1654 = vmatpush.bf16.msra.mxu0 %v2446_v11  ;;  %v1232_v7 = vpop.f32.mrf.mxu3  ;;  %v2530_v11 = vor.u32 %v2753_v16, %v2529_v52 }
  0xe1   :  { %1638 = vmatpush.bf16.msrb.mxu3 %v2530_v11 }
  0xe2   :  { %1664 = vmatpush.bf16.msra.mxu2 %v2534_v58  ;;  %v1456_v58 = vld [vmem:[%s3020_s5] sm:$0x3]  ;;  %s2868_s5 = smov 32  }
  0xe3   :  { %1655 = vmatpush.bf16.msra.mxu0 %v2438_v19  ;;  %v2749_v19 = vld [vmem:[#allocation7 + $0xa4] sm:$0xf0]  ;;  %v1458_v60 = vperm.slane %v1456_v58, 0  ;;  %v1459_v23 = vperm.slane %v1456_v58, 1 }
  0xe4   :  { %v2514_v4 = vor.u32 %v2749_v19, %v2513_v63 }
  0xe5   :  { %1639 = vmatpush.bf16.msrb.mxu3 %v2522_v34 }
  0xe6   :  { %1665 = vmatpush.bf16.msra.mxu2 %v2526_v2 }
  0xe9   :  { %1640 = vmatpush.bf16.msrb.mxu3 %v2514_v4 }
  0xea   :  { %v1269_v10 = vpop.f32.mrf.mxu2  ;;  %1666 = vmatpush.bf16.msra.mxu2 %v2518_v5 }
  0xef   :  { %v1243_v13 = vpop.f32.mrf.mxu0 }
  0xf0   :  { %v1244_v14 = vadd.f32 %v1243_v13, %v1231_v12  ;;  %v2506_v12 = vor.u32 %v2747_v9, %v2505_v8  ;;  %v2507_v13 = vld [vmem:[#allocation7 + $0x98] sm:$0xf0] }
  0xf2   :  { %v1256_v15 = vpop.f32.mrf.mxu1  ;;  %v1271_v17 = vpop.f32.mrf.mxu2  ;;  %1641 = vmatpush.bf16.msrb.mxu3 %v2506_v12 }
  0xf3   :  { %v1257_v18 = vadd.f32 %v1256_v15, %v1244_v14  ;;  %v2497_v17 = vld [vmem:[#allocation7 + $0x80] sm:$0xf] }
  0xf5   :  { %v1270_v20 = vadd.f32 %v1269_v10, %v1257_v18  ;;  %v2746_v10 = vld [vmem:[#allocation7 + $0x94] sm:$0xf]  ;;  %v2745_v18 = vld [vmem:[#allocation7 + $0x84] sm:$0xf0] }
  0xf6   :  { %v2510_v15 = vor.u32 %v2746_v10, %v2507_v13 }
  0xf7   :  { %v2984_v21 = vpop.f32.mrf.mxu3  ;;  %vm1416_vm2 = vcmp.gt.f32.partialorder %v1270_v20, 0.0  ;;  %v1418_v22 = vmul.f32 0.01, %v1270_v20  ;;  %v1245_v24 = vpop.f32.mrf.mxu0 }
  0xf8   :  { %v1283_v7 = vadd.f32 %v2984_v21, %v271_v0  ;;  %1667 = vmatpush.bf16.msra.mxu2 %v2510_v15  ;;  %v2499_v24 = vld [vmem:[#allocation7 + $0x88] sm:$0xf0] }
  0xf9   :  { %v1420_v25 = vsel %vm1416_vm2, %v1270_v20, %v1418_v22  ;;  %v2744_v20 = vld [vmem:[#allocation7 + $0x84] sm:$0xf]  ;;  %v2498_v22 = vor.u32 %v2745_v18, %v2497_v17 }
  0xfa   :  { %v1422_v26 = vpack.c.bf16 %v1420_v25, %v1420_v25  ;;  %v1258_v27 = vpop.f32.mrf.mxu1  ;;  %v2502_v25 = vor.u32 %v2744_v20, %v2499_v24 }
  0xfb   :  { %1642 = vmatpush.bf16.msrb.mxu3 %v2498_v22  ;;  %v1679_v27 = vld [vmem:[%s3016_s1] sm:$0xff]  ;;  %s2866_s1 = smov 64  }
  0xfc   :  { %1630 = vmatmul.bf16.vlgmr.msrb.gmra.mxu1 %v1422_v26  ;;  %1656 = vmatmul.bf16.vlgmr.msra.gmra.mxu0 %v1422_v26 }
  0xfd   :  { %1668 = vmatpush.bf16.msra.mxu2 %v2502_v25  ;;  %1688 = vperm.xlu0 %2772, %v1679_v27  }
  0xfe   :  { %1708 = vperm.xlu1 %2774, %v1679_v27   ;;  %1682 = vperm.xlu2 %2775, %v1679_v27  }
  0xff   :  { %v1284_v28 = vpop.f32.mrf.mxu3 }
 0x106   :  { %1731 = vrot.lane.b32.xlu1 %v2777_v30, %s2866_s1 }
 0x10a   :  { %v2986_v29 = vpop.f32.mrf.mxu2 }
 0x10b   :  { %v1296_v14 = vadd.f32 %v2986_v29, %v1283_v7 }
 0x10f   :  { %v2988_v37 = vpop.f32.mrf.mxu0 }
 0x110   :  { %v1309_v21 = vadd.f32 %v2988_v37, %v1296_v14 }
 0x112   :  { %v2990_v51 = vpop.f32.mrf.mxu1  ;;  %v1297_v42 = vpop.f32.mrf.mxu2 }
 0x113   :  { %v1322_v28 = vadd.f32 %v2990_v51, %v1309_v21  ;;  %v2865_v51 = vmov 2  }
 0x114   :  { %2773 = vset.pattern.permute.xlu0 %v2865_v51 }
 0x115   :  { %1698 = vperm.xlu0 %2773, %v1679_v27  }
 0x117   :  { %v2992_v53 = vpop.f32.mrf.mxu3  ;;  %v1310_v57 = vpop.f32.mrf.mxu0 }
 0x118   :  { %v1335_v33 = vadd.f32 %v2992_v53, %v1322_v28 }
 0x11a   :  { %v1323_v59 = vpop.f32.mrf.mxu1 }
 0x11d   :  { %2776 = vset.pattern.permute.xlu0 %v2863_v48 }
 0x11f   :  { %v1336_v1 = vpop.f32.mrf.mxu3 }
 0x12a   :  { %v1347_v43 = vpop.f32.mrf.mxu2 }
 0x12b   :  { %v1348_v39 = vadd.f32 %v1347_v43, %v1335_v33 }
 0x12f   :  { %v1360_v26 = vpop.f32.mrf.mxu0 }
 0x130   :  { %v1361_v42 = vadd.f32 %v1360_v26, %v1348_v39 }
 0x132   :  { %v1373_v29 = vpop.f32.mrf.mxu1  ;;  %v1349_v31 = vpop.f32.mrf.mxu2 }
 0x133   :  { %v1374_v45 = vadd.f32 %v1373_v29, %v1361_v42 }
 0x137   :  { %v1386_v35 = vpop.f32.mrf.mxu3  ;;  %v1362_v37 = vpop.f32.mrf.mxu0 }
 0x138   :  { %v1387_v46 = vadd.f32 %v1386_v35, %v1374_v45  ;;  %v2778_v37 = vld [vmem:[#allocation2] ss:$0 sm:$0xff] }
 0x13a   :  { %v1375_v40 = vpop.f32.mrf.mxu1 }
 0x13f   :  { %v1388_v6 = vpop.f32.mrf.mxu3 }
 0x143   :  { %v1412_v44 = vpop.f32.mrf.mxu0 }
 0x14a   :  { %v1399_v36 = vpop.f32.mrf.mxu2 }
 0x14b   :  { %v1400_v47 = vadd.f32 %v1399_v36, %v1387_v46  ;;  %v1414_v49 = vpop.f32.mrf.mxu0 }
 0x14d   :  { %v1413_v50 = vadd.f32 %v1412_v44, %v1400_v47 }
 0x14f   :  { %vm1417_vm3 = vcmp.gt.f32.partialorder %v1413_v50, 0.0  ;;  %v1419_v52 = vmul.f32 0.01, %v1413_v50 }
 0x151   :  { %v1421_v16 = vsel %vm1417_vm3, %v1413_v50, %v1419_v52 }
 0x152   :  { %v1423_v53 = vpack.c.bf16 %v1421_v16, %v1421_v16  ;;  %v1401_v54 = vpop.f32.mrf.mxu2 }
 0x154   :  { %1643 = vmatmul.bf16.vlgmr.msrb.gmra.mxu3 %v1423_v53  ;;  %1669 = vmatmul.bf16.vlgmr.msra.gmra.mxu2 %v1423_v53 }
 0x158   :  { %v1683_v2 = vpop.permute.xlu2 %1682 }
 0x16f   :  { %v1689_v59 = vpop.permute.xlu0 %1688 }
 0x170   :  { %v1709_v62 = vpop.permute.xlu1 %1708 }
 0x178   :  { %v1732_v14 = vpop.permute.xlu1 %1731 }
 0x179   :  { %v1631_v55 = vpop.f32.mrf.mxu1  ;;  %v1657_v56 = vpop.f32.mrf.mxu0 }
 0x17a   :  { %v1632_v61 = vadd.f32 %v1631_v55, %v1458_v60  ;;  %v1658_v34 = vadd.f32 %v1657_v56, %v1459_v23 }
 0x181   :  { %v1633_v57 = vpop.f32.mrf.mxu1  ;;  %v1659_v11 = vpop.f32.mrf.mxu0 }
 0x187   :  { %v1699_v41 = vpop.permute.xlu0 %1698 }
 0x1d7   :  { %v1644_v63 = vpop.f32.mrf.mxu3  ;;  %v1670_v19 = vpop.f32.mrf.mxu2 }
 0x1d8   :  { %v1645_v0 = vadd.f32 %v1644_v63, %v1632_v61  ;;  %v1671_v1 = vadd.f32 %v1670_v19, %v1658_v34 }
 0x1da   :  { %v1674_v3 = vand.u32 2147483647, %v1645_v0  ;;  %v1675_v4 = vand.u32 2147483647, %v1671_v1  ;;  %v1677_v9 = vmul.f32 0.01, %v1671_v1 }
 0x1db   :  { %vm1676_vm4 = vcmp.gt.f32.partialorder %v1671_v1, 0.0 }
 0x1dc   :  { %v1685_v5 = vmul.f32 %v1683_v2, %v1674_v3  ;;  %v1701_v7 = vmul.f32 %v1699_v41, %v1674_v3  ;;  %v1691_v8 = vmul.f32 %v1689_v59, %v1674_v3  ;;  %1724 = vrot.lane.b32.xlu0 %v1675_v4, %s2867_s26  ;;  %v1678_v43 = vsel %vm1676_vm4, %v1671_v1, %v1677_v9 }
 0x1dd   :  { %v1734_v15 = vmul.f32 %v1732_v14, %v1678_v43  ;;  %v1711_v17 = vmul.f32 %v1709_v62, %v1674_v3 }
 0x1de   :  { %1703 = vrot.lane.b32.xlu1 %v1701_v7, %s2866_s1  ;;  %1693 = vrot.lane.b32.xlu2 %v1691_v8, %s2867_s26  ;;  %v1686_v10 = vadd.f32 %v1685_v5, %v1671_v1 }
 0x1df   :  { %v1646_v12 = vpop.f32.mrf.mxu3  ;;  %v1672_v13 = vpop.f32.mrf.mxu2 }
 0x1e6   :  { %1736 = vrot.lane.b32.xlu1 %v1734_v15, %s2866_s1  ;;  %1713 = vrot.lane.b32.xlu2 %v1711_v17, %s2868_s5 }
 0x238   :  { %v1694_v18 = vpop.permute.xlu2 %1693 }
 0x239   :  { %v1696_v20 = vadd.f32 %v1694_v18, %v1686_v10 }
 0x240   :  { %v1714_v21 = vpop.permute.xlu2 %1713 }
 0x24e   :  { %v1725_v31 = vpop.permute.xlu0 %1724 }
 0x250   :  { %v1704_v22 = vpop.permute.xlu1 %1703 }
 0x251   :  { %v1706_v24 = vadd.f32 %v1704_v22, %v1696_v20 }
 0x253   :  { %v1716_v25 = vadd.f32 %v1714_v21, %v1706_v24 }
 0x255   :  { %v1718_v26 = vmin.f32 %v1716_v25, 0.0  ;;  %vm1717_vm5 = vcmp.gt.f32.partialorder %v1716_v25, 0.0 }
 0x257   :  { %v1719_v27 = vmul.f32 1.442695, %v1718_v26 }
 0x258   :  { %v1737_v38 = vpop.permute.xlu1 %1736 }
 0x259   :  { %2779 = vpow2.f32 %v1719_v27 }
 0x25f   :  { %v2780_v28 = vpop.eup %2779 }
 0x260   :  { %v2559_v29 = vadd.f32 -1.0, %v2780_v28 }
 0x262   :  { %v1722_v32 = vsel %vm1717_vm5, %v1716_v25, %v2559_v29 }
 0x263   :  { %v1727_v48 = vmul.f32 %v1725_v31, %v1722_v32 }
 0x265   :  { %v1739_v33 = vadd.f32 %v1737_v38, %v1727_v48 }
 0x267   :  { %v1741_v35 = vsel %vm1740_vm6, %v1739_v33, 0.0 }
 0x268   :  { %1742 = vadd.xlane.f32.xlu2 %v1741_v35 }
 0x2db   :  { %v1743_v30 = vpop.xlane.xlu2 %1742 }
 0x2dc   :  { %v1748_v39 = vadd.f32 %v2778_v37, %v1743_v30 }
 0x2de   :  { %1750 = vst.msk [vmem:[%s3023_s8] sm:$0xff] %vm1749_vm7, %v1748_v39 }
 0x2df   :  { %1755 = vsyncpa [#allocation4], 1 }
 0x2e0   :  { %1756 = vsyncpa [#allocation6], 1 }

</bundles_post_ra>
